<compile_context>
chip_gen: v7x
topology: tpu7x:2x2x1
jax: 0.10.0
libtpu: 0.0.40
codegen_flags: <defaults>
</compile_context>

<pallas_src>
import math
import functools

import jax
import jax.numpy as jnp
from jax.experimental import pallas as pl
from jax.experimental.pallas import tpu as pltpu

# ------------------------- config (small, synthetic) -------------------------
BATCH = 2
SEQ = 8               # max_length
HIDDEN = 128          # BERT-base uses 768; scaled down per instructions
NUM_HEADS = 4
HEAD_DIM = HIDDEN // NUM_HEADS
INTERMEDIATE = 4 * HIDDEN
NUM_LAYERS = 2        # BERT-base uses 12
VOCAB = 128
TARGET_NUM = 4
LN_EPS = 1e-12
ACT_DTYPE = jnp.bfloat16    # activations / matmul inputs
W_DTYPE = jnp.bfloat16      # matmul weights
F32 = jnp.float32


# ------------------------------ Pallas kernels -------------------------------
def _ln_kernel(x_ref, g_ref, b_ref, o_ref, *, eps):
    """Residual-free LayerNorm over the last axis (f32 math)."""
    y = x_ref[...].astype(F32)
    mu = jnp.mean(y, axis=-1, keepdims=True)
    var = jnp.mean(jnp.square(y - mu), axis=-1, keepdims=True)
    yn = (y - mu) * jax.lax.rsqrt(var + eps)
    o_ref[...] = (yn * g_ref[...] + b_ref[...]).astype(o_ref.dtype)


def layernorm(x, gamma, beta, eps=LN_EPS, row_tile=8):
    """LayerNorm [M, H] -> [M, H] (bf16 out), row-tiled parallel grid."""
    M, H = x.shape
    if M % row_tile != 0:
        row_tile = M
    return pl.pallas_call(
        functools.partial(_ln_kernel, eps=eps),
        out_shape=jax.ShapeDtypeStruct((M, H), ACT_DTYPE),
        grid=(M // row_tile,),
        in_specs=[
            pl.BlockSpec((row_tile, H), lambda i: (i, 0)),
            pl.BlockSpec((1, H), lambda i: (0, 0)),
            pl.BlockSpec((1, H), lambda i: (0, 0)),
        ],
        out_specs=pl.BlockSpec((row_tile, H), lambda i: (i, 0)),
        compiler_params=pltpu.CompilerParams(dimension_semantics=("parallel",)),
    )(x, gamma.reshape(1, H), beta.reshape(1, H))


def _bert_layer_kernel(x_ref, mask_ref, wqkv_ref, bqkv_ref, wo_ref, bo_ref,
                       ln1g_ref, ln1b_ref, w1_ref, b1_ref, w2_ref, b2_ref,
                       ln2g_ref, ln2b_ref, o_ref, *, num_heads, head_dim, scale, eps):
    """One full BERT encoder layer for one batch element, entirely in VMEM."""
    H = num_heads * head_dim
    x = x_ref[0]                       # [S, H] bf16
    mask = mask_ref[0]                 # [1, S] f32 additive (0 or -1e9)

    def layer_norm(y, g, b):           # y: [S, H] f32, g/b: [1, H] f32
        mu = jnp.mean(y, axis=-1, keepdims=True)
        var = jnp.mean(jnp.square(y - mu), axis=-1, keepdims=True)
        return (y - mu) * jax.lax.rsqrt(var + eps) * g + b

    # ---- fused QKV projection: one [S,H] @ [H,3H] MXU matmul ----
    qkv = jnp.dot(x, wqkv_ref[...], preferred_element_type=F32) + bqkv_ref[...]  # [S,3H] f32

    # ---- multi-head attention; heads sliced from the lane axis, output
    #      projection decomposed per head (no concat / transposes in HBM) ----
    attn = jnp.zeros((x.shape[0], H), F32) + bo_ref[...]
    for h in range(num_heads):
        lo = h * head_dim
        qh = qkv[:, lo:lo + head_dim]                       # [S, Dh]
        kh = qkv[:, H + lo:H + lo + head_dim]               # [S, Dh]
        vh = qkv[:, 2 * H + lo:2 * H + lo + head_dim]       # [S, Dh]
        s = jnp.dot(qh, kh.T, preferred_element_type=F32) * scale + mask  # [S,S]
        s = s - jnp.max(s, axis=-1, keepdims=True)
        p = jnp.exp(s)
        p = p * pl.reciprocal(jnp.sum(p, axis=-1, keepdims=True), approx=True)
        ctx_h = jnp.dot(p, vh, preferred_element_type=F32)                # [S, Dh]
        attn = attn + jnp.dot(ctx_h.astype(wo_ref.dtype),
                              wo_ref[lo:lo + head_dim, :],
                              preferred_element_type=F32)

    # ---- residual + LayerNorm 1 (f32) ----
    x1 = layer_norm(attn + x.astype(F32), ln1g_ref[...], ln1b_ref[...])

    # ---- FFN with GELU + residual + LayerNorm 2 ----
    # TODO(synk): HF BertModel default hidden_act is exact-erf GELU; tanh
    # approximation is used here (small numerical difference).
    h1 = jnp.dot(x1.astype(w1_ref.dtype), w1_ref[...],
                 preferred_element_type=F32) + b1_ref[...]                # [S, I]
    h1 = 0.5 * h1 * (1.0 + jnp.tanh(0.7978845608028654 * (h1 + 0.044715 * h1 * h1 * h1)))
    h2 = jnp.dot(h1.astype(w2_ref.dtype), w2_ref[...],
                 preferred_element_type=F32) + b2_ref[...]                # [S, H]
    x2 = layer_norm(h2 + x1, ln2g_ref[...], ln2b_ref[...])

    o_ref[0] = x2.astype(o_ref.dtype)


def bert_layer(x, mask_add, p):
    """x: [B, S, H] bf16, mask_add: [B, 1, S] f32 -> [B, S, H] bf16."""
    B, S, H = x.shape
    kern = functools.partial(
        _bert_layer_kernel,
        num_heads=NUM_HEADS, head_dim=HEAD_DIM,
        scale=1.0 / math.sqrt(HEAD_DIM), eps=LN_EPS)
    return pl.pallas_call(
        kern,
        out_shape=jax.ShapeDtypeStruct((B, S, H), x.dtype),
        grid=(B,),
        in_specs=[
            pl.BlockSpec((1, S, H), lambda i: (i, 0, 0)),          # x
            pl.BlockSpec((1, 1, S), lambda i: (i, 0, 0)),          # mask (no repeat)
            pl.BlockSpec((H, 3 * H), lambda i: (0, 0)),            # wqkv
            pl.BlockSpec((1, 3 * H), lambda i: (0, 0)),            # bqkv
            pl.BlockSpec((H, H), lambda i: (0, 0)),                # wo
            pl.BlockSpec((1, H), lambda i: (0, 0)),                # bo
            pl.BlockSpec((1, H), lambda i: (0, 0)),                # ln1_g
            pl.BlockSpec((1, H), lambda i: (0, 0)),                # ln1_b
            pl.BlockSpec((H, INTERMEDIATE), lambda i: (0, 0)),     # w1
            pl.BlockSpec((1, INTERMEDIATE), lambda i: (0, 0)),     # b1
            pl.BlockSpec((INTERMEDIATE, H), lambda i: (0, 0)),     # w2
            pl.BlockSpec((1, H), lambda i: (0, 0)),                # b2
            pl.BlockSpec((1, H), lambda i: (0, 0)),                # ln2_g
            pl.BlockSpec((1, H), lambda i: (0, 0)),                # ln2_b
        ],
        out_specs=pl.BlockSpec((1, S, H), lambda i: (i, 0, 0)),
        compiler_params=pltpu.CompilerParams(dimension_semantics=("parallel",)),
    )(x, mask_add, p["wqkv"], p["bqkv"], p["wo"], p["bo"],
      p["ln1_g"], p["ln1_b"], p["w1"], p["b1"], p["w2"], p["b2"],
      p["ln2_g"], p["ln2_b"])


# --------------------------- parameters (synthetic) ---------------------------
def init_params(key):
    ks = jax.random.split(key, 4 + NUM_LAYERS)

    def nrm(k, shape, dtype=W_DTYPE):
        return (0.02 * jax.random.normal(k, shape, dtype=F32)).astype(dtype)

    params = {
        "word_emb": nrm(ks[0], (VOCAB, HIDDEN), F32),
        "pos_emb": nrm(ks[1], (SEQ, HIDDEN), F32),
        "type_emb": nrm(ks[2], (2, HIDDEN), F32),
        "emb_ln_g": jnp.ones((HIDDEN,), F32),
        "emb_ln_b": jnp.zeros((HIDDEN,), F32),
        "dense_w": nrm(ks[3], (HIDDEN, TARGET_NUM), F32),   # self.dense = nn.Linear(H, target_num)
        "dense_b": jnp.zeros((TARGET_NUM,), F32),
        "layers": [],
    }
    for l in range(NUM_LAYERS):
        lk = jax.random.split(ks[4 + l], 6)
        wq, wk, wv = nrm(lk[0], (HIDDEN, HIDDEN)), nrm(lk[1], (HIDDEN, HIDDEN)), nrm(lk[2], (HIDDEN, HIDDEN))
        params["layers"].append({
            "wqkv": jnp.concatenate([wq, wk, wv], axis=1),          # [H, 3H] bf16
            "bqkv": jnp.zeros((1, 3 * HIDDEN), F32),
            "wo": nrm(lk[3], (HIDDEN, HIDDEN)),
            "bo": jnp.zeros((1, HIDDEN), F32),
            "ln1_g": jnp.ones((1, HIDDEN), F32),
            "ln1_b": jnp.zeros((1, HIDDEN), F32),
            "w1": nrm(lk[4], (HIDDEN, INTERMEDIATE)),
            "b1": jnp.zeros((1, INTERMEDIATE), F32),
            "w2": nrm(lk[5], (INTERMEDIATE, HIDDEN)),
            "b2": jnp.zeros((1, HIDDEN), F32),
            "ln2_g": jnp.ones((1, HIDDEN), F32),
            "ln2_b": jnp.zeros((1, HIDDEN), F32),
        })
    return params


# -------------------------------- forward pass --------------------------------
def bert_classification_forward(params, input_ids, attention_mask):
    # TODO(synk): BertTokenizer.batch_encode_plus (string tokenization) has no
    # Pallas equivalent; input_ids / attention_mask are supplied precomputed.
    B, S = input_ids.shape
    H = HIDDEN

    # embedding gathers + sum in plain JAX (gather has no cheap Pallas win here)
    emb = (params["word_emb"][input_ids]
           + params["pos_emb"][None, :S, :]
           + params["type_emb"][0][None, None, :]).astype(F32)      # [B, S, H]

    # residual-free embedding LayerNorm (Pallas, bf16 out)
    x = layernorm(emb.reshape(B * S, H), params["emb_ln_g"], params["emb_ln_b"])
    x = x.reshape(B, S, H)

    mask_add = ((1.0 - attention_mask.astype(F32)) * -1e9).reshape(B, 1, S)
    for layer in params["layers"]:
        x = bert_layer(x, mask_add, layer)

    hidden = x.astype(F32)                    # bert_output[0]  (last_hidden_state)
    cls = hidden[:, 0, :]                     # bert_output[0][:, 0, :]
    # classification head in plain JAX: 2x128 @ 128x4 (lane width 4 << 128,
    # a Pallas call here is pure launch overhead + masked partial stores)
    logits = cls @ params["dense_w"] + params["dense_b"]
    return cls, logits                        # (bert_cls_hidden_state, linear_output)


# ------------------------------------ main ------------------------------------
if __name__ == "__main__":
    key = jax.random.PRNGKey(0)
    pkey, ikey = jax.random.split(key)
    params = init_params(pkey)

    input_ids = jax.random.randint(ikey, (BATCH, SEQ), 0, VOCAB, dtype=jnp.int32)
    # second "sentence" is padded on the last 2 positions
    attention_mask = jnp.array([[1] * SEQ, [1] * (SEQ - 2) + [0] * 2], dtype=jnp.int32)

    fwd = jax.jit(functools.partial(bert_classification_forward, params))
    cls_hidden, logits = fwd(input_ids, attention_mask)
    jax.block_until_ready((cls_hidden, logits))

    assert cls_hidden.shape == (BATCH, HIDDEN)
    assert logits.shape == (BATCH, TARGET_NUM)
    assert bool(jnp.all(jnp.isfinite(cls_hidden))) and bool(jnp.all(jnp.isfinite(logits)))
    print("KERNEL_OK")
</pallas_src>

<mosaic_0001>
module attributes {stable_mosaic.version = 11 : i64} {
  func.func @_ln_kernel(%arg0: i32, %arg1: memref<8x128xf32, #tpu.memory_space<vmem>>, %arg2: memref<1x128xf32, #tpu.memory_space<vmem>>, %arg3: memref<1x128xf32, #tpu.memory_space<vmem>>, %arg4: memref<8x128xbf16, #tpu.memory_space<vmem>>) attributes {dimension_semantics = [#tpu.dimension_semantics<parallel>], iteration_bounds = array<i64: 2>, scalar_prefetch = 0 : i64, scratch_operands = 0 : i64, tpu.core_type = #tpu.core_type<tc>, window_params = [{transform_indices = @transform_0, window_bounds = array<i64: 8, 128>}, {pipeline_mode = #tpu.pipeline_mode<synchronous>, transform_indices = @transform_1, window_bounds = array<i64: 1, 128>}, {pipeline_mode = #tpu.pipeline_mode<synchronous>, transform_indices = @transform_2, window_bounds = array<i64: 1, 128>}, {transform_indices = @transform_3, window_bounds = array<i64: 8, 128>}]} {
    %c0 = arith.constant 0 : index
    %c0_0 = arith.constant 0 : index
    %0 = vector.load %arg1[%c0, %c0_0] : memref<8x128xf32, #tpu.memory_space<vmem>>, vector<8x128xf32>
    %cst = arith.constant dense<0.000000e+00> : vector<8xf32>
    %1 = vector.multi_reduction <add>, %0, %cst [1] : vector<8x128xf32> to vector<8xf32>
    %2 = vector.shape_cast %1 : vector<8xf32> to vector<8x1xf32>
    %cst_1 = arith.constant 1.280000e+02 : f32
    %3 = vector.broadcast %cst_1 : f32 to vector<8x1xf32>
    %4 = arith.divf %2, %3 : vector<8x1xf32>
    %5 = vector.broadcast %4 : vector<8x1xf32> to vector<8x128xf32>
    %6 = arith.subf %0, %5 : vector<8x128xf32>
    %7 = arith.mulf %6, %6 : vector<8x128xf32>
    %cst_2 = arith.constant dense<0.000000e+00> : vector<8xf32>
    %8 = vector.multi_reduction <add>, %7, %cst_2 [1] : vector<8x128xf32> to vector<8xf32>
    %9 = vector.shape_cast %8 : vector<8xf32> to vector<8x1xf32>
    %cst_3 = arith.constant 1.280000e+02 : f32
    %10 = vector.broadcast %cst_3 : f32 to vector<8x1xf32>
    %11 = arith.divf %9, %10 : vector<8x1xf32>
    %12 = vector.broadcast %4 : vector<8x1xf32> to vector<8x128xf32>
    %13 = arith.subf %0, %12 : vector<8x128xf32>
    %cst_4 = arith.constant 9.99999996E-13 : f32
    %14 = vector.broadcast %cst_4 : f32 to vector<8x1xf32>
    %15 = arith.addf %11, %14 : vector<8x1xf32>
    %16 = math.rsqrt %15 : vector<8x1xf32>
    %17 = vector.broadcast %16 : vector<8x1xf32> to vector<8x128xf32>
    %18 = arith.mulf %13, %17 : vector<8x128xf32>
    %c0_5 = arith.constant 0 : index
    %c0_6 = arith.constant 0 : index
    %19 = vector.load %arg2[%c0_5, %c0_6] : memref<1x128xf32, #tpu.memory_space<vmem>>, vector<1x128xf32>
    %20 = vector.broadcast %19 : vector<1x128xf32> to vector<8x128xf32>
    %21 = arith.mulf %18, %20 : vector<8x128xf32>
    %c0_7 = arith.constant 0 : index
    %c0_8 = arith.constant 0 : index
    %22 = vector.load %arg3[%c0_7, %c0_8] : memref<1x128xf32, #tpu.memory_space<vmem>>, vector<1x128xf32>
    %23 = vector.broadcast %22 : vector<1x128xf32> to vector<8x128xf32>
    %24 = arith.addf %21, %23 : vector<8x128xf32>
    %25 = arith.truncf %24 : vector<8x128xf32> to vector<8x128xbf16>
    %c0_9 = arith.constant 0 : index
    %c0_10 = arith.constant 0 : index
    %26 = vector.load %arg4[%c0_9, %c0_10] : memref<8x128xbf16, #tpu.memory_space<vmem>>, vector<8x128xbf16>
    tpu.vector_store %arg4[%c0_9, %c0_10], %25 {strides = array<i32>} : memref<8x128xbf16, #tpu.memory_space<vmem>>, vector<8x128xbf16>,
    return
  }
  func.func @transform_0(%arg0: i32) -> (i32, i32) {
    %c0_i32 = arith.constant 0 : i32
    %c0_i32_0 = arith.constant 0 : i32
    return %arg0, %c0_i32 : i32, i32
  }
  func.func @transform_1(%arg0: i32) -> (i32, i32) {
    %c0_i32 = arith.constant 0 : i32
    %c0_i32_0 = arith.constant 0 : i32
    %c0_i32_1 = arith.constant 0 : i32
    return %c0_i32, %c0_i32_0 : i32, i32
  }
  func.func @transform_2(%arg0: i32) -> (i32, i32) {
    %c0_i32 = arith.constant 0 : i32
    %c0_i32_0 = arith.constant 0 : i32
    %c0_i32_1 = arith.constant 0 : i32
    return %c0_i32, %c0_i32_0 : i32, i32
  }
  func.func @transform_3(%arg0: i32) -> (i32, i32) {
    %c0_i32 = arith.constant 0 : i32
    %c0_i32_0 = arith.constant 0 : i32
    return %arg0, %c0_i32 : i32, i32
  }
}

module attributes {stable_mosaic.version = 11 : i64} {
  func.func @_bert_layer_kernel(%arg0: i32, %arg1: memref<1x8x128xbf16, #tpu.memory_space<vmem>>, %arg2: memref<1x1x8xf32, #tpu.memory_space<vmem>>, %arg3: memref<128x384xbf16, #tpu.memory_space<vmem>>, %arg4: memref<1x384xf32, #tpu.memory_space<vmem>>, %arg5: memref<128x128xbf16, #tpu.memory_space<vmem>>, %arg6: memref<1x128xf32, #tpu.memory_space<vmem>>, %arg7: memref<1x128xf32, #tpu.memory_space<vmem>>, %arg8: memref<1x128xf32, #tpu.memory_space<vmem>>, %arg9: memref<128x512xbf16, #tpu.memory_space<vmem>>, %arg10: memref<1x512xf32, #tpu.memory_space<vmem>>, %arg11: memref<512x128xbf16, #tpu.memory_space<vmem>>, %arg12: memref<1x128xf32, #tpu.memory_space<vmem>>, %arg13: memref<1x128xf32, #tpu.memory_space<vmem>>, %arg14: memref<1x128xf32, #tpu.memory_space<vmem>>, %arg15: memref<1x8x128xbf16, #tpu.memory_space<vmem>>) attributes {dimension_semantics = [#tpu.dimension_semantics<parallel>], iteration_bounds = array<i64: 2>, scalar_prefetch = 0 : i64, scratch_operands = 0 : i64, tpu.core_type = #tpu.core_type<tc>, window_params = [{transform_indices = @transform_0, window_bounds = array<i64: 1, 8, 128>}, {transform_indices = @transform_1, window_bounds = array<i64: 1, 1, 8>}, {pipeline_mode = #tpu.pipeline_mode<synchronous>, transform_indices = @transform_2, window_bounds = array<i64: 128, 384>}, {pipeline_mode = #tpu.pipeline_mode<synchronous>, transform_indices = @transform_3, window_bounds = array<i64: 1, 384>}, {pipeline_mode = #tpu.pipeline_mode<synchronous>, transform_indices = @transform_4, window_bounds = array<i64: 128, 128>}, {pipeline_mode = #tpu.pipeline_mode<synchronous>, transform_indices = @transform_5, window_bounds = array<i64: 1, 128>}, {pipeline_mode = #tpu.pipeline_mode<synchronous>, transform_indices = @transform_6, window_bounds = array<i64: 1, 128>}, {pipeline_mode = #tpu.pipeline_mode<synchronous>, transform_indices = @transform_7, window_bounds = array<i64: 1, 128>}, {pipeline_mode = #tpu.pipeline_mode<synchronous>, transform_indices = @transform_8, window_bounds = array<i64: 128, 512>}, {pipeline_mode = #tpu.pipeline_mode<synchronous>, transform_indices = @transform_9, window_bounds = array<i64: 1, 512>}, {pipeline_mode = #tpu.pipeline_mode<synchronous>, transform_indices = @transform_10, window_bounds = array<i64: 512, 128>}, {pipeline_mode = #tpu.pipeline_mode<synchronous>, transform_indices = @transform_11, window_bounds = array<i64: 1, 128>}, {pipeline_mode = #tpu.pipeline_mode<synchronous>, transform_indices = @transform_12, window_bounds = array<i64: 1, 128>}, {pipeline_mode = #tpu.pipeline_mode<synchronous>, transform_indices = @transform_13, window_bounds = array<i64: 1, 128>}, {transform_indices = @transform_14, window_bounds = array<i64: 1, 8, 128>}]} {
    %c0 = arith.constant 0 : index
    %c0_0 = arith.constant 0 : index
    %c0_1 = arith.constant 0 : index
    %0 = vector.load %arg1[%c0, %c0_0, %c0_1] : memref<1x8x128xbf16, #tpu.memory_space<vmem>>, vector<1x8x128xbf16>
    %1 = vector.shape_cast %0 : vector<1x8x128xbf16> to vector<8x128xbf16>
    %c0_2 = arith.constant 0 : index
    %c0_3 = arith.constant 0 : index
    %c0_4 = arith.constant 0 : index
    %2 = vector.load %arg2[%c0_2, %c0_3, %c0_4] : memref<1x1x8xf32, #tpu.memory_space<vmem>>, vector<1x1x8xf32>
    %3 = vector.shape_cast %2 : vector<1x1x8xf32> to vector<1x8xf32>
    %c0_5 = arith.constant 0 : index
    %c0_6 = arith.constant 0 : index
    %4 = vector.load %arg3[%c0_5, %c0_6] : memref<128x384xbf16, #tpu.memory_space<vmem>>, vector<128x384xbf16>
    %cst = arith.constant dense<0.000000e+00> : vector<8x384xf32>
    %5 = tpu.matmul %1, %4, %cst {dimension_numbers = #tpu.dot_dimension_numbers<[1], [0], [0], [1], [0, 0, 1, 1], [], []>} : vector<8x128xbf16>, vector<128x384xbf16>, vector<8x384xf32> -> vector<8x384xf32>
    %c0_7 = arith.constant 0 : index
    %c0_8 = arith.constant 0 : index
    %6 = vector.load %arg4[%c0_7, %c0_8] : memref<1x384xf32, #tpu.memory_space<vmem>>, vector<1x384xf32>
    %7 = vector.broadcast %6 : vector<1x384xf32> to vector<8x384xf32>
    %8 = arith.addf %5, %7 : vector<8x384xf32>
    %cst_9 = arith.constant 0.000000e+00 : f32
    %9 = vector.broadcast %cst_9 : f32 to vector<8x128xf32>
    %c0_10 = arith.constant 0 : index
    %c0_11 = arith.constant 0 : index
    %10 = vector.load %arg6[%c0_10, %c0_11] : memref<1x128xf32, #tpu.memory_space<vmem>>, vector<1x128xf32>
    %11 = vector.broadcast %10 : vector<1x128xf32> to vector<8x128xf32>
    %12 = arith.addf %9, %11 : vector<8x128xf32>
    %13 = vector.extract_strided_slice %8 {offsets = [0, 0], sizes = [8, 32], strides = [1, 1]} : vector<8x384xf32> to vector<8x32xf32>
    %14 = vector.extract_strided_slice %8 {offsets = [0, 128], sizes = [8, 32], strides = [1, 1]} : vector<8x384xf32> to vector<8x32xf32>
    %15 = vector.extract_strided_slice %8 {offsets = [0, 256], sizes = [8, 32], strides = [1, 1]} : vector<8x384xf32> to vector<8x32xf32>
    %16 = tpu.transpose %14, [1, 0] : vector<8x32xf32> -> vector<32x8xf32>
    %cst_12 = arith.constant dense<0.000000e+00> : vector<8x8xf32>
    %17 = tpu.matmul %13, %16, %cst_12 {dimension_numbers = #tpu.dot_dimension_numbers<[1], [0], [0], [1], [0, 0, 1, 1], [], []>} : vector<8x32xf32>, vector<32x8xf32>, vector<8x8xf32> -> vector<8x8xf32>
    %cst_13 = arith.constant 0.176776692 : f32
    %18 = vector.broadcast %cst_13 : f32 to vector<8x8xf32>
    %19 = arith.mulf %17, %18 : vector<8x8xf32>
    %20 = vector.broadcast %3 : vector<1x8xf32> to vector<8x8xf32>
    %21 = arith.addf %19, %20 : vector<8x8xf32>
    %cst_14 = arith.constant dense<0xFF800000> : vector<8xf32>
    %22 = vector.multi_reduction <maximumf>, %21, %cst_14 [1] : vector<8x8xf32> to vector<8xf32>
    %23 = vector.shape_cast %22 : vector<8xf32> to vector<8x1xf32>
    %24 = vector.broadcast %23 : vector<8x1xf32> to vector<8x8xf32>
    %25 = arith.subf %21, %24 : vector<8x8xf32>
    %26 = math.exp %25 : vector<8x8xf32>
    %cst_15 = arith.constant dense<0.000000e+00> : vector<8xf32>
    %27 = vector.multi_reduction <add>, %26, %cst_15 [1] : vector<8x8xf32> to vector<8xf32>
    %28 = vector.shape_cast %27 : vector<8xf32> to vector<8x1xf32>
    %29 = tpu.reciprocal %28 {approx = true} : vector<8x1xf32> -> vector<8x1xf32>
    %30 = vector.broadcast %29 : vector<8x1xf32> to vector<8x8xf32>
    %31 = arith.mulf %26, %30 : vector<8x8xf32>
    %cst_16 = arith.constant dense<0.000000e+00> : vector<8x32xf32>
    %32 = tpu.matmul %31, %15, %cst_16 {dimension_numbers = #tpu.dot_dimension_numbers<[1], [0], [0], [1], [0, 0, 1, 1], [], []>} : vector<8x8xf32>, vector<8x32xf32>, vector<8x32xf32> -> vector<8x32xf32>
    %33 = arith.truncf %32 : vector<8x32xf32> to vector<8x32xbf16>
    %c0_17 = arith.constant 0 : index
    %c0_18 = arith.constant 0 : index
    %34 = vector.load %arg5[%c0_17, %c0_18] : memref<128x128xbf16, #tpu.memory_space<vmem>>, vector<32x128xbf16>
    %cst_19 = arith.constant dense<0.000000e+00> : vector<8x128xf32>
    %35 = tpu.matmul %33, %34, %cst_19 {dimension_numbers = #tpu.dot_dimension_numbers<[1], [0], [0], [1], [0, 0, 1, 1], [], []>} : vector<8x32xbf16>, vector<32x128xbf16>, vector<8x128xf32> -> vector<8x128xf32>
    %36 = arith.addf %12, %35 : vector<8x128xf32>
    %37 = vector.extract_strided_slice %8 {offsets = [0, 32], sizes = [8, 32], strides = [1, 1]} : vector<8x384xf32> to vector<8x32xf32>
    %38 = vector.extract_strided_slice %8 {offsets = [0, 160], sizes = [8, 32], strides = [1, 1]} : vector<8x384xf32> to vector<8x32xf32>
    %39 = vector.extract_strided_slice %8 {offsets = [0, 288], sizes = [8, 32], strides = [1, 1]} : vector<8x384xf32> to vector<8x32xf32>
    %40 = tpu.transpose %38, [1, 0] : vector<8x32xf32> -> vector<32x8xf32>
    %cst_20 = arith.constant dense<0.000000e+00> : vector<8x8xf32>
    %41 = tpu.matmul %37, %40, %cst_20 {dimension_numbers = #tpu.dot_dimension_numbers<[1], [0], [0], [1], [0, 0, 1, 1], [], []>} : vector<8x32xf32>, vector<32x8xf32>, vector<8x8xf32> -> vector<8x8xf32>
    %cst_21 = arith.constant 0.176776692 : f32
    %42 = vector.broadcast %cst_21 : f32 to vector<8x8xf32>
    %43 = arith.mulf %41, %42 : vector<8x8xf32>
    %44 = vector.broadcast %3 : vector<1x8xf32> to vector<8x8xf32>
    %45 = arith.addf %43, %44 : vector<8x8xf32>
    %cst_22 = arith.constant dense<0xFF800000> : vector<8xf32>
    %46 = vector.multi_reduction <maximumf>, %45, %cst_22 [1] : vector<8x8xf32> to vector<8xf32>
    %47 = vector.shape_cast %46 : vector<8xf32> to vector<8x1xf32>
    %48 = vector.broadcast %47 : vector<8x1xf32> to vector<8x8xf32>
    %49 = arith.subf %45, %48 : vector<8x8xf32>
    %50 = math.exp %49 : vector<8x8xf32>
    %cst_23 = arith.constant dense<0.000000e+00> : vector<8xf32>
    %51 = vector.multi_reduction <add>, %50, %cst_23 [1] : vector<8x8xf32> to vector<8xf32>
    %52 = vector.shape_cast %51 : vector<8xf32> to vector<8x1xf32>
    %53 = tpu.reciprocal %52 {approx = true} : vector<8x1xf32> -> vector<8x1xf32>
    %54 = vector.broadcast %53 : vector<8x1xf32> to vector<8x8xf32>
    %55 = arith.mulf %50, %54 : vector<8x8xf32>
    %cst_24 = arith.constant dense<0.000000e+00> : vector<8x32xf32>
    %56 = tpu.matmul %55, %39, %cst_24 {dimension_numbers = #tpu.dot_dimension_numbers<[1], [0], [0], [1], [0, 0, 1, 1], [], []>} : vector<8x8xf32>, vector<8x32xf32>, vector<8x32xf32> -> vector<8x32xf32>
    %57 = arith.truncf %56 : vector<8x32xf32> to vector<8x32xbf16>
    %c32 = arith.constant 32 : index
    %c0_25 = arith.constant 0 : index
    %58 = vector.load %arg5[%c32, %c0_25] : memref<128x128xbf16, #tpu.memory_space<vmem>>, vector<32x128xbf16>
    %cst_26 = arith.constant dense<0.000000e+00> : vector<8x128xf32>
    %59 = tpu.matmul %57, %58, %cst_26 {dimension_numbers = #tpu.dot_dimension_numbers<[1], [0], [0], [1], [0, 0, 1, 1], [], []>} : vector<8x32xbf16>, vector<32x128xbf16>, vector<8x128xf32> -> vector<8x128xf32>
    %60 = arith.addf %36, %59 : vector<8x128xf32>
    %61 = vector.extract_strided_slice %8 {offsets = [0, 64], sizes = [8, 32], strides = [1, 1]} : vector<8x384xf32> to vector<8x32xf32>
    %62 = vector.extract_strided_slice %8 {offsets = [0, 192], sizes = [8, 32], strides = [1, 1]} : vector<8x384xf32> to vector<8x32xf32>
    %63 = vector.extract_strided_slice %8 {offsets = [0, 320], sizes = [8, 32], strides = [1, 1]} : vector<8x384xf32> to vector<8x32xf32>
    %64 = tpu.transpose %62, [1, 0] : vector<8x32xf32> -> vector<32x8xf32>
    %cst_27 = arith.constant dense<0.000000e+00> : vector<8x8xf32>
    %65 = tpu.matmul %61, %64, %cst_27 {dimension_numbers = #tpu.dot_dimension_numbers<[1], [0], [0], [1], [0, 0, 1, 1], [], []>} : vector<8x32xf32>, vector<32x8xf32>, vector<8x8xf32> -> vector<8x8xf32>
    %cst_28 = arith.constant 0.176776692 : f32
    %66 = vector.broadcast %cst_28 : f32 to vector<8x8xf32>
    %67 = arith.mulf %65, %66 : vector<8x8xf32>
    %68 = vector.broadcast %3 : vector<1x8xf32> to vector<8x8xf32>
    %69 = arith.addf %67, %68 : vector<8x8xf32>
    %cst_29 = arith.constant dense<0xFF800000> : vector<8xf32>
    %70 = vector.multi_reduction <maximumf>, %69, %cst_29 [1] : vector<8x8xf32> to vector<8xf32>
    %71 = vector.shape_cast %70 : vector<8xf32> to vector<8x1xf32>
    %72 = vector.broadcast %71 : vector<8x1xf32> to vector<8x8xf32>
    %73 = arith.subf %69, %72 : vector<8x8xf32>
    %74 = math.exp %73 : vector<8x8xf32>
    %cst_30 = arith.constant dense<0.000000e+00> : vector<8xf32>
    %75 = vector.multi_reduction <add>, %74, %cst_30 [1] : vector<8x8xf32> to vector<8xf32>
    %76 = vector.shape_cast %75 : vector<8xf32> to vector<8x1xf32>
    %77 = tpu.reciprocal %76 {approx = true} : vector<8x1xf32> -> vector<8x1xf32>
    %78 = vector.broadcast %77 : vector<8x1xf32> to vector<8x8xf32>
    %79 = arith.mulf %74, %78 : vector<8x8xf32>
    %cst_31 = arith.constant dense<0.000000e+00> : vector<8x32xf32>
    %80 = tpu.matmul %79, %63, %cst_31 {dimension_numbers = #tpu.dot_dimension_numbers<[1], [0], [0], [1], [0, 0, 1, 1], [], []>} : vector<8x8xf32>, vector<8x32xf32>, vector<8x32xf32> -> vector<8x32xf32>
    %81 = arith.truncf %80 : vector<8x32xf32> to vector<8x32xbf16>
    %c64 = arith.constant 64 : index
    %c0_32 = arith.constant 0 : index
    %82 = vector.load %arg5[%c64, %c0_32] : memref<128x128xbf16, #tpu.memory_space<vmem>>, vector<32x128xbf16>
    %cst_33 = arith.constant dense<0.000000e+00> : vector<8x128xf32>
    %83 = tpu.matmul %81, %82, %cst_33 {dimension_numbers = #tpu.dot_dimension_numbers<[1], [0], [0], [1], [0, 0, 1, 1], [], []>} : vector<8x32xbf16>, vector<32x128xbf16>, vector<8x128xf32> -> vector<8x128xf32>
    %84 = arith.addf %60, %83 : vector<8x128xf32>
    %85 = vector.extract_strided_slice %8 {offsets = [0, 96], sizes = [8, 32], strides = [1, 1]} : vector<8x384xf32> to vector<8x32xf32>
    %86 = vector.extract_strided_slice %8 {offsets = [0, 224], sizes = [8, 32], strides = [1, 1]} : vector<8x384xf32> to vector<8x32xf32>
    %87 = vector.extract_strided_slice %8 {offsets = [0, 352], sizes = [8, 32], strides = [1, 1]} : vector<8x384xf32> to vector<8x32xf32>
    %88 = tpu.transpose %86, [1, 0] : vector<8x32xf32> -> vector<32x8xf32>
    %cst_34 = arith.constant dense<0.000000e+00> : vector<8x8xf32>
    %89 = tpu.matmul %85, %88, %cst_34 {dimension_numbers = #tpu.dot_dimension_numbers<[1], [0], [0], [1], [0, 0, 1, 1], [], []>} : vector<8x32xf32>, vector<32x8xf32>, vector<8x8xf32> -> vector<8x8xf32>
    %cst_35 = arith.constant 0.176776692 : f32
    %90 = vector.broadcast %cst_35 : f32 to vector<8x8xf32>
    %91 = arith.mulf %89, %90 : vector<8x8xf32>
    %92 = vector.broadcast %3 : vector<1x8xf32> to vector<8x8xf32>
    %93 = arith.addf %91, %92 : vector<8x8xf32>
    %cst_36 = arith.constant dense<0xFF800000> : vector<8xf32>
    %94 = vector.multi_reduction <maximumf>, %93, %cst_36 [1] : vector<8x8xf32> to vector<8xf32>
    %95 = vector.shape_cast %94 : vector<8xf32> to vector<8x1xf32>
    %96 = vector.broadcast %95 : vector<8x1xf32> to vector<8x8xf32>
    %97 = arith.subf %93, %96 : vector<8x8xf32>
    %98 = math.exp %97 : vector<8x8xf32>
    %cst_37 = arith.constant dense<0.000000e+00> : vector<8xf32>
    %99 = vector.multi_reduction <add>, %98, %cst_37 [1] : vector<8x8xf32> to vector<8xf32>
    %100 = vector.shape_cast %99 : vector<8xf32> to vector<8x1xf32>
    %101 = tpu.reciprocal %100 {approx = true} : vector<8x1xf32> -> vector<8x1xf32>
    %102 = vector.broadcast %101 : vector<8x1xf32> to vector<8x8xf32>
    %103 = arith.mulf %98, %102 : vector<8x8xf32>
    %cst_38 = arith.constant dense<0.000000e+00> : vector<8x32xf32>
    %104 = tpu.matmul %103, %87, %cst_38 {dimension_numbers = #tpu.dot_dimension_numbers<[1], [0], [0], [1], [0, 0, 1, 1], [], []>} : vector<8x8xf32>, vector<8x32xf32>, vector<8x32xf32> -> vector<8x32xf32>
    %105 = arith.truncf %104 : vector<8x32xf32> to vector<8x32xbf16>
    %c96 = arith.constant 96 : index
    %c0_39 = arith.constant 0 : index
    %106 = vector.load %arg5[%c96, %c0_39] : memref<128x128xbf16, #tpu.memory_space<vmem>>, vector<32x128xbf16>
    %cst_40 = arith.constant dense<0.000000e+00> : vector<8x128xf32>
    %107 = tpu.matmul %105, %106, %cst_40 {dimension_numbers = #tpu.dot_dimension_numbers<[1], [0], [0], [1], [0, 0, 1, 1], [], []>} : vector<8x32xbf16>, vector<32x128xbf16>, vector<8x128xf32> -> vector<8x128xf32>
    %108 = arith.addf %84, %107 : vector<8x128xf32>
    %109 = arith.extf %1 : vector<8x128xbf16> to vector<8x128xf32>
    %110 = arith.addf %108, %109 : vector<8x128xf32>
    %c0_41 = arith.constant 0 : index
    %c0_42 = arith.constant 0 : index
    %111 = vector.load %arg7[%c0_41, %c0_42] : memref<1x128xf32, #tpu.memory_space<vmem>>, vector<1x128xf32>
    %c0_43 = arith.constant 0 : index
    %c0_44 = arith.constant 0 : index
    %112 = vector.load %arg8[%c0_43, %c0_44] : memref<1x128xf32, #tpu.memory_space<vmem>>, vector<1x128xf32>
    %cst_45 = arith.constant dense<0.000000e+00> : vector<8xf32>
    %113 = vector.multi_reduction <add>, %110, %cst_45 [1] : vector<8x128xf32> to vector<8xf32>
    %114 = vector.shape_cast %113 : vector<8xf32> to vector<8x1xf32>
    %cst_46 = arith.constant 1.280000e+02 : f32
    %115 = vector.broadcast %cst_46 : f32 to vector<8x1xf32>
    %116 = arith.divf %114, %115 : vector<8x1xf32>
    %117 = vector.broadcast %116 : vector<8x1xf32> to vector<8x128xf32>
    %118 = arith.subf %110, %117 : vector<8x128xf32>
    %119 = arith.mulf %118, %118 : vector<8x128xf32>
    %cst_47 = arith.constant dense<0.000000e+00> : vector<8xf32>
    %120 = vector.multi_reduction <add>, %119, %cst_47 [1] : vector<8x128xf32> to vector<8xf32>
    %121 = vector.shape_cast %120 : vector<8xf32> to vector<8x1xf32>
    %cst_48 = arith.constant 1.280000e+02 : f32
    %122 = vector.broadcast %cst_48 : f32 to vector<8x1xf32>
    %123 = arith.divf %121, %122 : vector<8x1xf32>
    %124 = vector.broadcast %116 : vector<8x1xf32> to vector<8x128xf32>
    %125 = arith.subf %110, %124 : vector<8x128xf32>
    %cst_49 = arith.constant 9.99999996E-13 : f32
    %126 = vector.broadcast %cst_49 : f32 to vector<8x1xf32>
    %127 = arith.addf %123, %126 : vector<8x1xf32>
    %128 = math.rsqrt %127 : vector<8x1xf32>
    %129 = vector.broadcast %128 : vector<8x1xf32> to vector<8x128xf32>
    %130 = arith.mulf %125, %129 : vector<8x128xf32>
    %131 = vector.broadcast %111 : vector<1x128xf32> to vector<8x128xf32>
    %132 = arith.mulf %130, %131 : vector<8x128xf32>
    %133 = vector.broadcast %112 : vector<1x128xf32> to vector<8x128xf32>
    %134 = arith.addf %132, %133 : vector<8x128xf32>
    %135 = arith.truncf %134 : vector<8x128xf32> to vector<8x128xbf16>
    %c0_50 = arith.constant 0 : index
    %c0_51 = arith.constant 0 : index
    %136 = vector.load %arg9[%c0_50, %c0_51] : memref<128x512xbf16, #tpu.memory_space<vmem>>, vector<128x512xbf16>
    %cst_52 = arith.constant dense<0.000000e+00> : vector<8x512xf32>
    %137 = tpu.matmul %135, %136, %cst_52 {dimension_numbers = #tpu.dot_dimension_numbers<[1], [0], [0], [1], [0, 0, 1, 1], [], []>} : vector<8x128xbf16>, vector<128x512xbf16>, vector<8x512xf32> -> vector<8x512xf32>
    %c0_53 = arith.constant 0 : index
    %c0_54 = arith.constant 0 : index
    %138 = vector.load %arg10[%c0_53, %c0_54] : memref<1x512xf32, #tpu.memory_space<vmem>>, vector<1x512xf32>
    %139 = vector.broadcast %138 : vector<1x512xf32> to vector<8x512xf32>
    %140 = arith.addf %137, %139 : vector<8x512xf32>
    %cst_55 = arith.constant 5.000000e-01 : f32
    %141 = vector.broadcast %cst_55 : f32 to vector<8x512xf32>
    %142 = arith.mulf %141, %140 : vector<8x512xf32>
    %cst_56 = arith.constant 4.471500e-02 : f32
    %143 = vector.broadcast %cst_56 : f32 to vector<8x512xf32>
    %144 = arith.mulf %143, %140 : vector<8x512xf32>
    %145 = arith.mulf %144, %140 : vector<8x512xf32>
    %146 = arith.mulf %145, %140 : vector<8x512xf32>
    %147 = arith.addf %140, %146 : vector<8x512xf32>
    %cst_57 = arith.constant 0.797884583 : f32
    %148 = vector.broadcast %cst_57 : f32 to vector<8x512xf32>
    %149 = arith.mulf %148, %147 : vector<8x512xf32>
    %150 = math.tanh %149 : vector<8x512xf32>
    %cst_58 = arith.constant 1.000000e+00 : f32
    %151 = vector.broadcast %cst_58 : f32 to vector<8x512xf32>
    %152 = arith.addf %151, %150 : vector<8x512xf32>
    %153 = arith.mulf %142, %152 : vector<8x512xf32>
    %154 = arith.truncf %153 : vector<8x512xf32> to vector<8x512xbf16>
    %c0_59 = arith.constant 0 : index
    %c0_60 = arith.constant 0 : index
    %155 = vector.load %arg11[%c0_59, %c0_60] : memref<512x128xbf16, #tpu.memory_space<vmem>>, vector<512x128xbf16>
    %cst_61 = arith.constant dense<0.000000e+00> : vector<8x128xf32>
    %156 = tpu.matmul %154, %155, %cst_61 {dimension_numbers = #tpu.dot_dimension_numbers<[1], [0], [0], [1], [0, 0, 1, 1], [], []>} : vector<8x512xbf16>, vector<512x128xbf16>, vector<8x128xf32> -> vector<8x128xf32>
    %c0_62 = arith.constant 0 : index
    %c0_63 = arith.constant 0 : index
    %157 = vector.load %arg12[%c0_62, %c0_63] : memref<1x128xf32, #tpu.memory_space<vmem>>, vector<1x128xf32>
    %158 = vector.broadcast %157 : vector<1x128xf32> to vector<8x128xf32>
    %159 = arith.addf %156, %158 : vector<8x128xf32>
    %160 = arith.addf %159, %134 : vector<8x128xf32>
    %c0_64 = arith.constant 0 : index
    %c0_65 = arith.constant 0 : index
    %161 = vector.load %arg13[%c0_64, %c0_65] : memref<1x128xf32, #tpu.memory_space<vmem>>, vector<1x128xf32>
    %c0_66 = arith.constant 0 : index
    %c0_67 = arith.constant 0 : index
    %162 = vector.load %arg14[%c0_66, %c0_67] : memref<1x128xf32, #tpu.memory_space<vmem>>, vector<1x128xf32>
    %cst_68 = arith.constant dense<0.000000e+00> : vector<8xf32>
    %163 = vector.multi_reduction <add>, %160, %cst_68 [1] : vector<8x128xf32> to vector<8xf32>
    %164 = vector.shape_cast %163 : vector<8xf32> to vector<8x1xf32>
    %cst_69 = arith.constant 1.280000e+02 : f32
    %165 = vector.broadcast %cst_69 : f32 to vector<8x1xf32>
    %166 = arith.divf %164, %165 : vector<8x1xf32>
    %167 = vector.broadcast %166 : vector<8x1xf32> to vector<8x128xf32>
    %168 = arith.subf %160, %167 : vector<8x128xf32>
    %169 = arith.mulf %168, %168 : vector<8x128xf32>
    %cst_70 = arith.constant dense<0.000000e+00> : vector<8xf32>
    %170 = vector.multi_reduction <add>, %169, %cst_70 [1] : vector<8x128xf32> to vector<8xf32>
    %171 = vector.shape_cast %170 : vector<8xf32> to vector<8x1xf32>
    %cst_71 = arith.constant 1.280000e+02 : f32
    %172 = vector.broadcast %cst_71 : f32 to vector<8x1xf32>
    %173 = arith.divf %171, %172 : vector<8x1xf32>
    %174 = vector.broadcast %166 : vector<8x1xf32> to vector<8x128xf32>
    %175 = arith.subf %160, %174 : vector<8x128xf32>
    %cst_72 = arith.constant 9.99999996E-13 : f32
    %176 = vector.broadcast %cst_72 : f32 to vector<8x1xf32>
    %177 = arith.addf %173, %176 : vector<8x1xf32>
    %178 = math.rsqrt %177 : vector<8x1xf32>
    %179 = vector.broadcast %178 : vector<8x1xf32> to vector<8x128xf32>
    %180 = arith.mulf %175, %179 : vector<8x128xf32>
    %181 = vector.broadcast %161 : vector<1x128xf32> to vector<8x128xf32>
    %182 = arith.mulf %180, %181 : vector<8x128xf32>
    %183 = vector.broadcast %162 : vector<1x128xf32> to vector<8x128xf32>
    %184 = arith.addf %182, %183 : vector<8x128xf32>
    %185 = arith.truncf %184 : vector<8x128xf32> to vector<8x128xbf16>
    %c0_73 = arith.constant 0 : index
    %c0_74 = arith.constant 0 : index
    %c0_75 = arith.constant 0 : index
    %186 = vector.load %arg15[%c0_73, %c0_74, %c0_75] : memref<1x8x128xbf16, #tpu.memory_space<vmem>>, vector<1x8x128xbf16>
    %187 = vector.shape_cast %186 : vector<1x8x128xbf16> to vector<8x128xbf16>
    %188 = vector.shape_cast %185 : vector<8x128xbf16> to vector<1x8x128xbf16>
    tpu.vector_store %arg15[%c0_73, %c0_74, %c0_75], %188 {strides = array<i32>} : memref<1x8x128xbf16, #tpu.memory_space<vmem>>, vector<1x8x128xbf16>,
    return
  }
  func.func @transform_0(%arg0: i32) -> (i32, i32, i32) {
    %c0_i32 = arith.constant 0 : i32
    %c0_i32_0 = arith.constant 0 : i32
    %c0_i32_1 = arith.constant 0 : i32
    return %arg0, %c0_i32, %c0_i32_0 : i32, i32, i32
  }
  func.func @transform_1(%arg0: i32) -> (i32, i32, i32) {
    %c0_i32 = arith.constant 0 : i32
    %c0_i32_0 = arith.constant 0 : i32
    %c0_i32_1 = arith.constant 0 : i32
    return %arg0, %c0_i32, %c0_i32_0 : i32, i32, i32
  }
  func.func @transform_2(%arg0: i32) -> (i32, i32) {
    %c0_i32 = arith.constant 0 : i32
    %c0_i32_0 = arith.constant 0 : i32
    %c0_i32_1 = arith.constant 0 : i32
    return %c0_i32, %c0_i32_0 : i32, i32
  }
  func.func @transform_3(%arg0: i32) -> (i32, i32) {
    %c0_i32 = arith.constant 0 : i32
    %c0_i32_0 = arith.constant 0 : i32
    %c0_i32_1 = arith.constant 0 : i32
    return %c0_i32, %c0_i32_0 : i32, i32
  }
  func.func @transform_4(%arg0: i32) -> (i32, i32) {
    %c0_i32 = arith.constant 0 : i32
    %c0_i32_0 = arith.constant 0 : i32
    %c0_i32_1 = arith.constant 0 : i32
    return %c0_i32, %c0_i32_0 : i32, i32
  }
  func.func @transform_5(%arg0: i32) -> (i32, i32) {
    %c0_i32 = arith.constant 0 : i32
    %c0_i32_0 = arith.constant 0 : i32
    %c0_i32_1 = arith.constant 0 : i32
    return %c0_i32, %c0_i32_0 : i32, i32
  }
  func.func @transform_6(%arg0: i32) -> (i32, i32) {
    %c0_i32 = arith.constant 0 : i32
    %c0_i32_0 = arith.constant 0 : i32
    %c0_i32_1 = arith.constant 0 : i32
    return %c0_i32, %c0_i32_0 : i32, i32
  }
  func.func @transform_7(%arg0: i32) -> (i32, i32) {
    %c0_i32 = arith.constant 0 : i32
    %c0_i32_0 = arith.constant 0 : i32
    %c0_i32_1 = arith.constant 0 : i32
    return %c0_i32, %c0_i32_0 : i32, i32
  }
  func.func @transform_8(%arg0: i32) -> (i32, i32) {
    %c0_i32 = arith.constant 0 : i32
    %c0_i32_0 = arith.constant 0 : i32
    %c0_i32_1 = arith.constant 0 : i32
    return %c0_i32, %c0_i32_0 : i32, i32
  }
  func.func @transform_9(%arg0: i32) -> (i32, i32) {
    %c0_i32 = arith.constant 0 : i32
    %c0_i32_0 = arith.constant 0 : i32
    %c0_i32_1 = arith.constant 0 : i32
    return %c0_i32, %c0_i32_0 : i32, i32
  }
  func.func @transform_10(%arg0: i32) -> (i32, i32) {
    %c0_i32 = arith.constant 0 : i32
    %c0_i32_0 = arith.constant 0 : i32
    %c0_i32_1 = arith.constant 0 : i32
    return %c0_i32, %c0_i32_0 : i32, i32
  }
  func.func @transform_11(%arg0: i32) -> (i32, i32) {
    %c0_i32 = arith.constant 0 : i32
    %c0_i32_0 = arith.constant 0 : i32
    %c0_i32_1 = arith.constant 0 : i32
    return %c0_i32, %c0_i32_0 : i32, i32
  }
  func.func @transform_12(%arg0: i32) -> (i32, i32) {
    %c0_i32 = arith.constant 0 : i32
    %c0_i32_0 = arith.constant 0 : i32
    %c0_i32_1 = arith.constant 0 : i32
    return %c0_i32, %c0_i32_0 : i32, i32
  }
  func.func @transform_13(%arg0: i32) -> (i32, i32) {
    %c0_i32 = arith.constant 0 : i32
    %c0_i32_0 = arith.constant 0 : i32
    %c0_i32_1 = arith.constant 0 : i32
    return %c0_i32, %c0_i32_0 : i32, i32
  }
  func.func @transform_14(%arg0: i32) -> (i32, i32, i32) {
    %c0_i32 = arith.constant 0 : i32
    %c0_i32_0 = arith.constant 0 : i32
    %c0_i32_1 = arith.constant 0 : i32
    return %arg0, %c0_i32, %c0_i32_0 : i32, i32, i32
  }
}

</mosaic_0001>

<bundles_post_ra>
// kernel: bert_classification_forward.3
= control target key start
LH: loop header
LB: loop body
LE: loop exit
PB: predicated region body
PF: predicated region fallthrough
CT: control target
= control target key end

     0   :  { %s299_s12 = smov 0   ;;  %s322_s0 = inlined_call_operand.vmem [shape: f32[16,128], index: 0, kind: input, shape index: {}]   ;;  %s323_s1 = inlined_call_operand.vmem [shape: f32[1,128], index: 1, kind: input, shape index: {}]   ;;  %s324_s2 = inlined_call_operand.vmem [shape: f32[1,128], index: 2, kind: input, shape index: {}]   ;;  %s325_s3 = inlined_call_operand.vmem [shape: bf16[16,128], index: 3, kind: output, shape index: {}]  }
   0x1 LB: > { %s250_s13 = sadd.s32 4294967295, %s277_s12   ;;  %p254_p0 = scmp.ge.s32.totalorder %s277_s12, 1  ;;  %s277_s12 = sphi %s299_s12, %s13_s12  }
   0x2   : > { %p136_p1 = scmp.lt.s32.totalorder %s277_s12, 3 }
   0x4   : > { %p137_p2 = pnand %p254_p0, %p136_p1 }
   0x5   : > { %p158_p3 = scmp.lt.s32.totalorder (!%p137_p2), %s250_s13, 1  ;;  %v257_v9 = vld [vmem:[%s323_s1] ss:$0 sm:$0xff] (!%p137_p2) }
   0x6   : > { %140 = sbr.rel (%p137_p2) target bundleno = 331 (0x14b), region = 32  ;;  %v258_v11 = vld [vmem:[%s324_s2] ss:$0 sm:$0xff] (!%p137_p2) }
   0xd   : > { %s327_s13 = smov (!%p158_p3, %s250_s13), 1 }
   0xe   : > { %s255_s14 = sshll.u32 %s327_s13, 3  ;;  %s256_s22 = sshll.u32 %s327_s13, 2 }
   0xf   : > { %s161_s17 = scalar_lea.vmem %s322_s0, %s255_s14  ;;  %s165_s25 = scalar_lea.vmem %s325_s3, %s256_s22 }
  0x10   : > { %v166_v0 = vld [vmem:[%s161_s17] sm:$0xff] }
  0x11   : > { %167 = vadd.xlane.f32.xlu0 %v166_v0 }
  0x9e   : > { %v168_v1 = vpop.xlane.xlu0 %167 }
  0x9f   : > { %v170_v2 = vmul.f32 0.0078125, %v168_v1 }
  0xa1   : > { %v171_v3 = vsub.f32 %v166_v0, %v170_v2 }
  0xa3   : > { %v172_v4 = vmul.f32 %v171_v3, %v171_v3 }
  0xa5   : > { %173 = vadd.xlane.f32.xlu0 %v172_v4 }
 0x132   : > { %v174_v5 = vpop.xlane.xlu0 %173 }
 0x133   : > { %v175_v6 = vmul.f32 0.0078125, %v174_v5 }
 0x135   : > { %v176_v7 = vadd.f32 1e-12, %v175_v6 }
 0x137   : > { %269 = vrsqrt.f32 %v176_v7 }
 0x141   : > { %v270_v8 = vpop.eup %269 }
 0x142   : > { %v178_v10 = vmul.f32 %v270_v8, %v171_v3 }
 0x144   : > { %v186_v12 = vmul.f32 %v257_v9, %v178_v10 }
 0x146   : > { %v194_v13 = vadd.f32 %v258_v11, %v186_v12 }
 0x148   : > { %v195_v14 = vpack.c.bf16 %v194_v13, %v194_v13 }
 0x14a   : > { %196 = vst [vmem:[%s165_s25] sm:$0xf] %v195_v14 }
 0x14b PF: > { %s13_s12 = sadd.s32 1, %s277_s12  }
 0x14c   : > { %p10_p4 = scmp.ge.s32.totalorder %s13_s12, 4  }
 0x14e   :  { %12 = sbr.rel (!%p10_p4) target bundleno = 1 (0x1), region = 62 }

// kernel: bert_classification_forward.4
= control target key start
LH: loop header
LB: loop body
LE: loop exit
PB: predicated region body
PF: predicated region fallthrough
CT: control target
= control target key end

     0   :  { %s3016_s29 = smov 0   ;;  %s3491_s0 = inlined_call_operand.vmem [shape: bf16[2,8,128], index: 0, kind: input, shape index: {}]   ;;  %s3492_s1 = inlined_call_operand.vmem [shape: f32[2,1,8], index: 1, kind: input, shape index: {}]   ;;  %s3493_s2 = inlined_call_operand.vmem [shape: bf16[128,384], index: 2, kind: input, shape index: {}]   ;;  %s3494_s3 = inlined_call_operand.vmem [shape: f32[1,384], index: 3, kind: input, shape index: {}]   ;;  %s3495_s4 = inlined_call_operand.vmem [shape: bf16[128,128], index: 4, kind: input, shape index: {}]   ;;  %s3496_s5 = inlined_call_operand.vmem [shape: f32[1,128], index: 5, kind: input, shape index: {}, may-alias: {5,7,11,13}]   ;;  %s3497_s6 = inlined_call_operand.vmem [shape: f32[1,128], index: 6, kind: input, shape index: {}, may-alias: {6,12}]   ;;  %s3498_s7 = inlined_call_operand.vmem [shape: f32[1,128], index: 7, kind: input, shape index: {}, may-alias: {5,7,11,13}]   ;;  %s3499_s8 = inlined_call_operand.vmem [shape: bf16[128,512], index: 8, kind: input, shape index: {}]   ;;  %s3500_s9 = inlined_call_operand.vmem [shape: f32[1,512], index: 9, kind: input, shape index: {}]   ;;  %s3501_s10 = inlined_call_operand.vmem [shape: bf16[512,128], index: 10, kind: input, shape index: {}]   ;;  %s3502_s11 = inlined_call_operand.vmem [shape: f32[1,128], index: 11, kind: input, shape index: {}, may-alias: {5,7,11,13}]   ;;  %s3503_s12 = inlined_call_operand.vmem [shape: f32[1,128], index: 12, kind: input, shape index: {}, may-alias: {6,12}]   ;;  %s3504_s13 = inlined_call_operand.vmem [shape: f32[1,128], index: 13, kind: input, shape index: {}, may-alias: {5,7,11,13}]   ;;  %s3505_s14 = inlined_call_operand.vmem [shape: bf16[2,8,128], index: 14, kind: output, shape index: {}]  }
   0x1 LB: > { %s2464_s30 = sadd.s32 4294967295, %s2933_s29   ;;  %p2468_p0 = scmp.ge.s32.totalorder %s2933_s29, 1  ;;  %s2933_s29 = sphi %s3016_s29, %s24_s29  }
   0x2   : > { %p419_p1 = scmp.lt.s32.totalorder %s2933_s29, 3 }
   0x4   : > { %p420_p2 = pnand %p2468_p0, %p419_p1 }
   0x5   : > { %v2779_v0 = vld [vmem:[%s3493_s2 + $0x4] ss:$12 sps:$4 sm:$0xff] (!%p420_p2)   ;;  %v2781_v1 = vld [vmem:[%s3493_s2] ss:$12 sps:$4 sm:$0xff] (!%p420_p2)   ;;  %v2935_v2 = vmov (!%p420_p2), 0   ;;  %v2936_v4 = vmov (!%p420_p2), 0.0   ;;  %v514_v27 = vlaneseq (!%p420_p2) }
   0x6   : > { %423 = sbr.rel (%p420_p2) target bundleno = 3909 (0xf45), region = 76  ;;  %689 = vmatprep.mubr.bf16.mxu0 (!%p420_p2), %v2935_v2  ;;  %657 = vmatprep.subr.bf16.mxu0 (!%p420_p2), %v2779_v0  ;;  %v2782_v3 = vld [vmem:[%s3493_s2 + $0x1c] ss:$12 sps:$4 sm:$0xff] (!%p420_p2)   ;;  %v2784_v5 = vld [vmem:[%s3493_s2 + $0x18] ss:$12 sps:$4 sm:$0xff] (!%p420_p2)   ;;  %vm2937_vm0 = vmmov (!%p420_p2), 0  }
   0x7   : > { %2673 = vmatprep.subr.bf16.mxu1 (!%p420_p2), %v2936_v4  ;;  %658 = vmatpush1.bf16.msra.mxu0 (!%p420_p2), %v2781_v1  ;;  %v2785_v6 = vld [vmem:[%s3493_s2 + $0x34] ss:$12 sps:$4 sm:$0xff] (!%p420_p2)   ;;  %p466_p3 = scmp.lt.s32.totalorder (!%p420_p2), %s2464_s30, 1  ;;  %v2787_v7 = vld [vmem:[%s3493_s2 + $0x30] ss:$12 sps:$4 sm:$0xff] (!%p420_p2)   ;;  %v3125_v28 = vshrl.u32 (!%p420_p2), %v514_v27, 7 }
   0x8   : > { %2689 = vmatprep.mubr.msk.bf16.mxu1 (!%p420_p2), %vm2937_vm0, %v2936_v4  ;;  %659 = vmatprep.subr.bf16.mxu0 (!%p420_p2), %v2782_v3  ;;  %v2788_v8 = vld [vmem:[%s3493_s2 + $0x4c] ss:$12 sps:$4 sm:$0xff] (!%p420_p2)   ;;  %v2790_v9 = vld [vmem:[%s3493_s2 + $0x48] ss:$12 sps:$4 sm:$0xff] (!%p420_p2)   ;;  %v2791_v11 = vld [vmem:[%s3493_s2 + $0x64] ss:$12 sps:$4 sm:$0xff] (!%p420_p2)  }
   0x9   : > { %v2803_v10 = vld [vmem:[%s3493_s2 + $0x8] ss:$12 sps:$4 sm:$0xff] (!%p420_p2)   ;;  %v2804_v12 = vld [vmem:[%s3493_s2 + $0x20] ss:$12 sps:$4 sm:$0xff] (!%p420_p2)   ;;  %v2796_v15 = vld [vmem:[%s3493_s2 + $0x78] ss:$12 sps:$4 sm:$0xff] (!%p420_p2)  }
   0xa   : > { %2674 = vmatpush3.bf16.msra.mxu1 (!%p420_p2), %v2803_v10  ;;  %v2793_v13 = vld [vmem:[%s3493_s2 + $0x60] ss:$12 sps:$4 sm:$0xff] (!%p420_p2)   ;;  %v2794_v14 = vld [vmem:[%s3493_s2 + $0x7c] ss:$12 sps:$4 sm:$0xff] (!%p420_p2)   ;;  %v2805_v16 = vld [vmem:[%s3493_s2 + $0x38] ss:$12 sps:$4 sm:$0xff] (!%p420_p2)  }
   0xb   : > { %660 = vmatpush1.bf16.msra.mxu0 (!%p420_p2), %v2784_v5  ;;  %2675 = vmatprep.subr.bf16.mxu1 (!%p420_p2), %v2936_v4  ;;  %v2797_v17 = vld [vmem:[%s3493_s2 + $0x94] ss:$12 sps:$4 sm:$0xff] (!%p420_p2)   ;;  %v2806_v18 = vld [vmem:[%s3493_s2 + $0x50] ss:$12 sps:$4 sm:$0xff] (!%p420_p2)   ;;  %v2800_v20 = vld [vmem:[%s3493_s2 + $0xac] ss:$12 sps:$4 sm:$0xff] (!%p420_p2)  }
   0xc   : > { %661 = vmatprep.subr.bf16.mxu0 (!%p420_p2), %v2785_v6  ;;  %v2799_v19 = vld [vmem:[%s3493_s2 + $0x90] ss:$12 sps:$4 sm:$0xff] (!%p420_p2)   ;;  %v2807_v21 = vld [vmem:[%s3493_s2 + $0x68] ss:$12 sps:$4 sm:$0xff] (!%p420_p2)   ;;  %v2808_v23 = vld [vmem:[%s3493_s2 + $0x80] ss:$12 sps:$4 sm:$0xff] (!%p420_p2)  }
   0xd   : > { %s3507_s30 = smov (!%p466_p3, %s2464_s30), 1  ;;  %v2802_v22 = vld [vmem:[%s3493_s2 + $0xa8] ss:$12 sps:$4 sm:$0xff]   ;;  %v2809_v25 = vld [vmem:[%s3493_s2 + $0x98] ss:$12 sps:$4 sm:$0xff]   ;;  %v520_v29 = vsub.s32 1, %v3125_v28 }
   0xe   : > { %s2469_s23 = sshll.u32 %s3507_s30, 2  ;;  %2676 = vmatpush3.bf16.msra.mxu1 %v2804_v12  ;;  %v2810_v26 = vld [vmem:[%s3493_s2 + $0xb0] ss:$12 sps:$4 sm:$0xff]   ;;  %v512_v30 = vld [vmem:[%s3494_s3] sm:$0x7]  ;;  %v516_v31 = vsub.s32 0, %v3125_v28  ;;  %s472_s18 = scalar_lea.vmem %s3492_s1, %s3507_s30 }
   0xf   : > { %662 = vmatpush1.bf16.msra.mxu0 %v2787_v7  ;;  %2677 = vmatprep.subr.bf16.mxu1 %v2936_v4  ;;  %s469_s19 = scalar_lea.vmem %s3491_s0, %s2469_s23  ;;  %v521_v32 = vrot.slane %v512_v30, %v520_v29  ;;  %vm746_vm1 = vcmask 261120   ;;  %v524_v39 = vsub.s32 2, %v3125_v28  ;;  %s2938_s15 = smov 96   ;;  %v3162_v48 = vld [vmem:[%s472_s18] ss:$0 sm:$0xff]  ;;  %vm831_vm2 = vcmask 64512  }
  0x10   : > { %663 = vmatprep.subr.bf16.mxu0 %v2788_v8  ;;  %v3106_v24 = vld [vmem:[%s469_s19] sm:$0xf]  ;;  %v517_v34 = vrot.slane %v512_v30, %v516_v31  ;;  %v2812_v0 = vld [vmem:[%s3495_s4 + $0x8] sm:$0xff]   ;;  %s2939_s24 = smov 64   ;;  %s2940_s25 = smov 32  }
  0x11   : > { %v525_v41 = vrot.slane %v512_v30, %v524_v39  ;;  %v2811_v58 = vld [vmem:[%s3495_s4] sm:$0xff]   ;;  %s476_s26 = scalar_lea.vmem %s3505_s14, %s2469_s23 }
  0x12   : > { %2678 = vmatpush3.bf16.msra.mxu1 %v2805_v16 }
  0x13   : > { %664 = vmatpush1.bf16.msra.mxu0 %v2790_v9  ;;  %2679 = vmatprep.subr.bf16.mxu1 %v2936_v4 }
  0x14   : > { %665 = vmatprep.subr.bf16.mxu0 %v2791_v11 }
  0x16   : > { %2680 = vmatpush3.bf16.msra.mxu1 %v2806_v18 }
  0x17   : > { %666 = vmatpush1.bf16.msra.mxu0 %v2793_v13  ;;  %2681 = vmatprep.subr.bf16.mxu1 %v2936_v4 }
  0x18   : > { %667 = vmatprep.subr.bf16.mxu0 %v2794_v14 }
  0x1a   : > { %2682 = vmatpush3.bf16.msra.mxu1 %v2807_v21 }
  0x1b   : > { %668 = vmatpush1.bf16.msra.mxu0 %v2796_v15  ;;  %2683 = vmatprep.subr.bf16.mxu1 %v2936_v4 }
  0x1c   : > { %669 = vmatprep.subr.bf16.mxu0 %v2797_v17  ;;  %v2813_v17 = vld [vmem:[%s3495_s4 + $0x10] sm:$0xff]  }
  0x1e   : > { %2684 = vmatpush3.bf16.msra.mxu1 %v2808_v23 }
  0x1f   : > { %670 = vmatpush1.bf16.msra.mxu0 %v2799_v19  ;;  %2685 = vmatprep.subr.bf16.mxu1 %v2936_v4 }
  0x20   : > { %671 = vmatprep.subr.bf16.mxu0 %v2800_v20 }
  0x22   : > { %2686 = vmatpush3.bf16.msra.mxu1 %v2809_v25 }
  0x23   : > { %672 = vmatpush1.bf16.msra.mxu0 %v2802_v22  ;;  %2687 = vmatprep.subr.bf16.mxu1 %v2936_v4 }
  0x24   : > { %2703 = vmatprep.subr.bf16.mxu0 %v2936_v4 }
  0x26   : > { %690 = vmatmul.mubr.bf16.vlgmr.msra.gmra.mrb[0].mxu0 %v3106_v24  ;;  %2688 = vmatpush3.bf16.msra.mxu1 %v2810_v26 }
  0x27   : > { %2707 = vmatprep.mubr.msk.bf16.mxu0 %vm2937_vm0, %v2936_v4  ;;  %2693 = vmatprep.subr.mxu1 %v2936_v4 }
  0x28   : > { %2704 = vmatpush3.bf16.msra.mxu0 %v2811_v58 }
  0x29   : > { %2690 = vmatmul.mubr.bf16.vlgmr.msra.gmra.mrb[0].mxu1 %v3106_v24  ;;  %2705 = vmatprep.subr.bf16.mxu0 %v2936_v4 }
  0x2a   : > { %2695 = vmatprep.mubr.msk.f32.mxu1 %vm2937_vm0, %v2936_v4 }
  0x2c   : > { %2706 = vmatpush3.bf16.msra.mxu0 %v2812_v0 }
  0x2d   : > { %2721 = vmatprep.subr.bf16.mxu0 %v2936_v4 }
  0xf9   : > { %v691_v33 = vpop.f32.mrb[0].mxu0 }
  0xfa   : > { %v693_v35 = vpop.f32.mrb[1].mxu0  ;;  %v3143_v40 = vadd.f32 %v691_v33, %v517_v34 }
  0xfb   : > { %v3136_v36 = vadd.f32 %v693_v35, %v521_v32  ;;  %v695_v37 = vpop.f32.mrb[2].mxu0  ;;  %v2814_v32 = vld [vmem:[%s3495_s4 + $0x18] sm:$0xff]  }
  0xfc   : > { %v696_v38 = vpop.f32.mrb[3].mxu0  ;;  %v732_v42 = vpop.f32.mrb[0].mxu1 }
  0xfd   : > { %979 = vrot.lane.b32.xlu1 %v3136_v36, %s2938_s15  ;;  %2694 = vmatpush3.xpose.msk.msra.mxu1 %vm746_vm1, %v3136_v36  ;;  %v3154_v43 = vadd.f32 %v732_v42, %v525_v41  ;;  %v2691_v44 = vpop.f32.mrb[1].mxu1 }
  0xfe   : > { %2698 = vmatprep.subr.mxu1 %v2936_v4  ;;  %v735_v45 = vpop.f32.mrb[2].mxu1 }
  0xff   : > { %v2692_v46 = vpop.f32.mrb[3].mxu1 }
 0x100   : > { %2696 = vmatmul.mubr.msk.f32.vlgmr.msra.gmra.mrb[4].mxu1 %vm746_vm1, %v3143_v40 }
 0x101   : > { %977 = vrot.lane.b32.xlu1 %v3143_v40, %s2938_s15  ;;  %2700 = vmatprep.mubr.msk.f32.mxu1 %vm2937_vm0, %v2936_v4 }
 0x102   : > { %2699 = vmatpush3.msra.mxu1 %v3154_v43 }
 0x103   : > { %2711 = vmatprep.subr.mxu1 %v2936_v4 }
 0x16f   : > { %v980_v61 = vpop.permute.xlu1 %979 }
 0x173   : > { %v978_v63 = vpop.permute.xlu1 %977 }
 0x1d3   : > { %v819_v47 = vpop.f32.mrb[4].mxu1 }
 0x1d4   : > { %v823_v49 = vmul.f32 0.17677669, %v819_v47  ;;  %v2697_v50 = vpop.f32.mrb[5].mxu1 }
 0x1d5   : > { %v2815_v50 = vld [vmem:[%s3495_s4 + $0x20] sm:$0xff]  }
 0x1d6   : > { %v830_v51 = vadd.f32 %v3162_v48, %v823_v49 }
 0x1d8   : > { %v832_v52 = vsel %vm831_vm2, %v830_v51, -inf }
 0x1d9   : > { %833 = vmax.xlane.f32.xlu0 %v832_v52 }
 0x266   : > { %v834_v53 = vpop.xlane.xlu0 %833 }
 0x267   : > { %v835_v54 = vsub.f32 %v830_v51, %v834_v53  ;;  %v2495_v51 = vld [vmem:[%s3496_s5] ss:$0 sm:$0xff] }
 0x269   : > { %v836_v55 = vmul.f32 1.442695, %v835_v54 }
 0x26b   : > { %2899 = vpow2.f32 %v836_v55 }
 0x275   : > { %v2900_v56 = vpop.eup %2899 }
 0x276   : > { %v838_v57 = vsel %vm831_vm2, %v2900_v56, 0.0 }
 0x277   : > { %839 = vadd.xlane.f32.xlu0 %v838_v57 }
 0x304   : > { %v840_v59 = vpop.xlane.xlu0 %839 }
 0x305   : > { %2901 = vrcp.f32 %v840_v59 }
 0x30f   : > { %v2902_v60 = vpop.eup %2901 }
 0x310   : > { %v842_v62 = vmul.f32 %v2902_v60, %v2900_v56 }
 0x312   : > { %2701 = vmatmul.mubr.msk.f32.vlgmr.msra.gmra.mrb[6].mxu1 %vm831_vm2, %v842_v62  ;;  %v2816_v62 = vld [vmem:[%s3495_s4 + $0x28] sm:$0xff]  }
 0x313   : > { %2712 = vmatpush3.xpose.msk.msra.mxu1 %vm746_vm1, %v980_v61  ;;  %2713 = vmatprep.mubr.msk.f32.mxu1 %vm2937_vm0, %v2936_v4 }
 0x314   : > { %2716 = vmatprep.subr.mxu1 %v2936_v4 }
 0x316   : > { %2714 = vmatmul.mubr.msk.f32.vlgmr.msra.gmra.mrb[8].mxu1 %vm746_vm1, %v978_v63 }
 0x317   : > { %2718 = vmatprep.mubr.msk.f32.mxu1 %vm2937_vm0, %v2936_v4 }
 0x3e5   : > { %v912_v1 = vpop.f32.mrb[6].mxu1 }
 0x3e6   : > { %v916_v3 = vpack.c.bf16 %v912_v1, %v912_v1  ;;  %v2702_v5 = vpop.f32.mrb[7].mxu1 }
 0x3e8   : > { %2708 = vmatmul.mubr.msk.bf16.vlgmr.msra.gmra.mrb[4].mxu0 %vm746_vm1, %v916_v3 }
 0x3e9   : > { %v1051_v6 = vpop.f32.mrb[8].mxu1  ;;  %2725 = vmatprep.mubr.msk.bf16.mxu0 %vm2937_vm0, %v2936_v4  ;;  %2722 = vmatpush3.bf16.msra.mxu0 %v2813_v17 }
 0x3ea   : > { %v1055_v7 = vmul.f32 0.17677669, %v1051_v6  ;;  %v2715_v8 = vpop.f32.mrb[9].mxu1  ;;  %2723 = vmatprep.subr.bf16.mxu0 %v2936_v4 }
 0x3ec   : > { %v1056_v9 = vadd.f32 %v3162_v48, %v1055_v7 }
 0x3ed   : > { %2724 = vmatpush3.bf16.msra.mxu0 %v2814_v32 }
 0x3ee   : > { %v1057_v10 = vsel %vm831_vm2, %v1056_v9, -inf  ;;  %2739 = vmatprep.subr.bf16.mxu0 %v2936_v4 }
 0x3ef   : > { %1058 = vmax.xlane.f32.xlu0 %v1057_v10 }
 0x405   : > { %1069 = vrot.lane.b32.xlu0 %v3154_v43, %s2938_s15 }
 0x409   : > { %1208 = vrot.lane.b32.xlu0 %v3136_v36, %s2939_s24 }
 0x40d   : > { %1206 = vrot.lane.b32.xlu0 %v3143_v40, %s2939_s24 }
 0x47c   : > { %v1059_v11 = vpop.xlane.xlu0 %1058 }
 0x47d   : > { %v1060_v12 = vsub.f32 %v1056_v9, %v1059_v11 }
 0x47f   : > { %v1061_v13 = vmul.f32 1.442695, %v1060_v12 }
 0x480   : > { %v1070_v14 = vpop.permute.xlu0 %1069 }
 0x481   : > { %2903 = vpow2.f32 %v1061_v13  ;;  %2717 = vmatpush3.msra.mxu1 %v1070_v14 }
 0x482   : > { %2729 = vmatprep.subr.mxu1 %v2936_v4 }
 0x484   : > { %v1209_v25 = vpop.permute.xlu0 %1208 }
 0x488   : > { %v1207_v27 = vpop.permute.xlu0 %1206 }
 0x48b   : > { %v2904_v15 = vpop.eup %2903 }
 0x48c   : > { %v1063_v16 = vsel %vm831_vm2, %v2904_v15, 0.0 }
 0x48d   : > { %1064 = vadd.xlane.f32.xlu1 %v1063_v16 }
 0x49e   : > { %1297 = vrot.lane.b32.xlu1 %v3154_v43, %s2939_s24 }
 0x4a2   : > { %1436 = vrot.lane.b32.xlu1 %v3136_v36, %s2940_s25 }
 0x4bb   : > { %v970_v18 = vpop.f32.mrb[4].mxu0 }
 0x4bc   : > { %v2709_v19 = vpop.f32.mrb[5].mxu0  ;;  %v976_v52 = vadd.f32 %v2495_v51, %v970_v18 }
 0x4bd   : > { %v973_v20 = vpop.f32.mrb[6].mxu0 }
 0x4be   : > { %v2710_v21 = vpop.f32.mrb[7].mxu0 }
 0x51a   : > { %v1065_v22 = vpop.xlane.xlu1 %1064 }
 0x51b   : > { %2905 = vrcp.f32 %v1065_v22  ;;  %v2818_v22 = vld [vmem:[%s3495_s4 + $0x38] sm:$0xff]  }
 0x51e   : > { %v1298_v30 = vpop.permute.xlu1 %1297 }
 0x522   : > { %v1437_v58 = vpop.permute.xlu1 %1436 }
 0x525   : > { %v2906_v23 = vpop.eup %2905 }
 0x526   : > { %v1067_v26 = vmul.f32 %v2906_v23, %v2904_v15 }
 0x528   : > { %2719 = vmatmul.mubr.msk.f32.vlgmr.msra.gmra.mrb[10].mxu1 %vm831_vm2, %v1067_v26  ;;  %v1662_v26 = vunpack.c.l.bf16 %v3106_v24  ;;  %v2824_v24 = vld [vmem:[%s3499_s8 + $0xc] ss:$16 sps:$4 sm:$0xff]  }
 0x529   : > { %2730 = vmatpush3.xpose.msk.msra.mxu1 %vm746_vm1, %v1209_v25  ;;  %2731 = vmatprep.mubr.msk.f32.mxu1 %vm2937_vm0, %v2936_v4 }
 0x52a   : > { %2734 = vmatprep.subr.mxu1 %v2936_v4 }
 0x52c   : > { %2732 = vmatmul.mubr.msk.f32.vlgmr.msra.gmra.mrb[12].mxu1 %vm746_vm1, %v1207_v27 }
 0x52d   : > { %2735 = vmatpush3.msra.mxu1 %v1298_v30  ;;  %2736 = vmatprep.mubr.msk.f32.mxu1 %vm2937_vm0, %v2936_v4 }
 0x52e   : > { %2747 = vmatprep.subr.mxu1 %v2936_v4 }
 0x5fb   : > { %v1141_v33 = vpop.f32.mrb[10].mxu1 }
 0x5fc   : > { %v1145_v34 = vpack.c.bf16 %v1141_v33, %v1141_v33  ;;  %v2720_v35 = vpop.f32.mrb[11].mxu1 }
 0x5fe   : > { %2726 = vmatmul.mubr.msk.bf16.vlgmr.msra.gmra.mrb[8].mxu0 %vm746_vm1, %v1145_v34 }
 0x5ff   : > { %v1280_v36 = vpop.f32.mrb[12].mxu1  ;;  %2743 = vmatprep.mubr.msk.bf16.mxu0 %vm2937_vm0, %v2936_v4  ;;  %2740 = vmatpush3.bf16.msra.mxu0 %v2815_v50 }
 0x600   : > { %v1284_v37 = vmul.f32 0.17677669, %v1280_v36  ;;  %v2733_v38 = vpop.f32.mrb[13].mxu1  ;;  %2741 = vmatprep.subr.bf16.mxu0 %v2936_v4  ;;  %v2819_v36 = vld [vmem:[%s3499_s8] ss:$16 sps:$4 sm:$0xff]  }
 0x601   : > { %v2827_v38 = vld [vmem:[%s3499_s8 + $0x24] ss:$16 sps:$4 sm:$0xff]  }
 0x602   : > { %v1285_v41 = vadd.f32 %v3162_v48, %v1284_v37  ;;  %v2821_v37 = vld [vmem:[%s3499_s8 + $0x4] ss:$16 sps:$4 sm:$0xff]  }
 0x603   : > { %2742 = vmatpush3.bf16.msra.mxu0 %v2816_v62  ;;  %v2854_v62 = vld [vmem:[%s3499_s8 + $0xac] ss:$16 sps:$4 sm:$0xff]  }
 0x604   : > { %v1286_v42 = vsel %vm831_vm2, %v1285_v41, -inf  ;;  %2757 = vmatprep.subr.bf16.mxu0 %v2936_v4 }
 0x605   : > { %1287 = vmax.xlane.f32.xlu0 %v1286_v42  ;;  %v2825_v42 = vld [vmem:[%s3499_s8 + $0x20] ss:$16 sps:$4 sm:$0xff]  }
 0x692   : > { %v1288_v44 = vpop.xlane.xlu0 %1287 }
 0x693   : > { %v1289_v45 = vsub.f32 %v1285_v41, %v1288_v44  ;;  %v2830_v41 = vld [vmem:[%s3499_s8 + $0x2c] ss:$16 sps:$4 sm:$0xff]   ;;  %v2828_v44 = vld [vmem:[%s3499_s8 + $0x28] ss:$16 sps:$4 sm:$0xff]  }
 0x695   : > { %v1290_v46 = vmul.f32 1.442695, %v1289_v45  ;;  %v2833_v45 = vld [vmem:[%s3499_s8 + $0x44] ss:$16 sps:$4 sm:$0xff]  }
 0x697   : > { %2907 = vpow2.f32 %v1290_v46  ;;  %v2836_v46 = vld [vmem:[%s3499_s8 + $0x4c] ss:$16 sps:$4 sm:$0xff]  }
 0x6a1   : > { %v2908_v47 = vpop.eup %2907 }
 0x6a2   : > { %v1292_v49 = vsel %vm831_vm2, %v2908_v47, 0.0 }
 0x6a3   : > { %1293 = vadd.xlane.f32.xlu1 %v1292_v49  ;;  %v2834_v49 = vld [vmem:[%s3499_s8 + $0x48] ss:$16 sps:$4 sm:$0xff]  }
 0x6b4   : > { %1434 = vrot.lane.b32.xlu1 %v3143_v40, %s2940_s25 }
 0x6d1   : > { %v1199_v53 = vpop.f32.mrb[8].mxu0 }
 0x6d2   : > { %v1205_v54 = vadd.f32 %v1199_v53, %v976_v52  ;;  %v2727_v55 = vpop.f32.mrb[9].mxu0 }
 0x6d3   : > { %v1202_v56 = vpop.f32.mrb[10].mxu0  ;;  %v2842_v55 = vld [vmem:[%s3499_s8 + $0x6c] ss:$16 sps:$4 sm:$0xff]  }
 0x6d4   : > { %v2728_v57 = vpop.f32.mrb[11].mxu0  ;;  %v2837_v56 = vld [vmem:[%s3499_s8 + $0x60] ss:$16 sps:$4 sm:$0xff]  }
 0x6d5   : > { %v2840_v57 = vld [vmem:[%s3499_s8 + $0x68] ss:$16 sps:$4 sm:$0xff]  }
 0x730   : > { %v1294_v59 = vpop.xlane.xlu1 %1293 }
 0x731   : > { %2909 = vrcp.f32 %v1294_v59  ;;  %v2848_v59 = vld [vmem:[%s3499_s8 + $0x8c] ss:$16 sps:$4 sm:$0xff]  }
 0x734   : > { %v1435_v61 = vpop.permute.xlu1 %1434 }
 0x73b   : > { %v2910_v40 = vpop.eup %2909 }
 0x73c   : > { %v1296_v60 = vmul.f32 %v2910_v40, %v2908_v47  ;;  %v2831_v47 = vld [vmem:[%s3499_s8 + $0x40] ss:$16 sps:$4 sm:$0xff]  }
 0x73d   : > { %v2843_v40 = vld [vmem:[%s3499_s8 + $0x80] ss:$16 sps:$4 sm:$0xff]  }
 0x73e   : > { %2737 = vmatmul.mubr.msk.f32.vlgmr.msra.gmra.mrb[14].mxu1 %vm831_vm2, %v1296_v60  ;;  %v2846_v60 = vld [vmem:[%s3499_s8 + $0x88] ss:$16 sps:$4 sm:$0xff]  }
 0x73f   : > { %2748 = vmatpush3.xpose.msk.msra.mxu1 %vm746_vm1, %v1437_v58  ;;  %2749 = vmatprep.mubr.msk.f32.mxu1 %vm2937_vm0, %v2936_v4  ;;  %v2845_v58 = vld [vmem:[%s3499_s8 + $0x84] ss:$16 sps:$4 sm:$0xff]  }
 0x740   : > { %2752 = vmatprep.subr.mxu1 %v2936_v4 }
 0x742   : > { %2750 = vmatmul.mubr.msk.f32.vlgmr.msra.gmra.mrb[16].mxu1 %vm746_vm1, %v1435_v61  ;;  %v2851_v61 = vld [vmem:[%s3499_s8 + $0xa4] ss:$16 sps:$4 sm:$0xff]  }
 0x743   : > { %2754 = vmatprep.mubr.msk.f32.mxu1 %vm2937_vm0, %v2936_v4 }
 0x811   : > { %v1369_v63 = vpop.f32.mrb[14].mxu1 }
 0x812   : > { %v1373_v0 = vpack.c.bf16 %v1369_v63, %v1369_v63  ;;  %v2738_v1 = vpop.f32.mrb[15].mxu1  ;;  %v2849_v63 = vld [vmem:[%s3499_s8 + $0xa0] ss:$16 sps:$4 sm:$0xff]  }
 0x813   : > { %v2857_v1 = vld [vmem:[%s3499_s8 + $0xc4] ss:$16 sps:$4 sm:$0xff]  }
 0x814   : > { %2744 = vmatmul.mubr.msk.bf16.vlgmr.msra.gmra.mrb[12].mxu0 %vm746_vm1, %v1373_v0  ;;  %v2852_v0 = vld [vmem:[%s3499_s8 + $0xa8] ss:$16 sps:$4 sm:$0xff]  }
 0x815   : > { %v1508_v3 = vpop.f32.mrb[16].mxu1  ;;  %2761 = vmatprep.mubr.msk.bf16.mxu0 %vm2937_vm0, %v2936_v4 }
 0x816   : > { %v1512_v5 = vmul.f32 0.17677669, %v1508_v3  ;;  %v2751_v6 = vpop.f32.mrb[17].mxu1  ;;  %v2860_v3 = vld [vmem:[%s3499_s8 + $0xcc] ss:$16 sps:$4 sm:$0xff]  }
 0x817   : > { %v2858_v6 = vld [vmem:[%s3499_s8 + $0xc8] ss:$16 sps:$4 sm:$0xff]  }
 0x818   : > { %v1513_v7 = vadd.f32 %v3162_v48, %v1512_v5  ;;  %v2817_v48 = vld [vmem:[%s3495_s4 + $0x30] sm:$0xff]  }
 0x819   : > { %2758 = vmatpush3.bf16.msra.mxu0 %v2817_v48  ;;  %v2855_v5 = vld [vmem:[%s3499_s8 + $0xc0] ss:$16 sps:$4 sm:$0xff]  }
 0x81a   : > { %v1514_v8 = vsel %vm831_vm2, %v1513_v7, -inf  ;;  %2759 = vmatprep.subr.bf16.mxu0 %v2936_v4  ;;  %v2521_v48 = vld [vmem:[%s3497_s6] ss:$0 sm:$0xff] }
 0x81b   : > { %1515 = vmax.xlane.f32.xlu0 %v1514_v8  ;;  %v2866_v8 = vld [vmem:[%s3499_s8 + $0xec] ss:$16 sps:$4 sm:$0xff]  }
 0x81d   : > { %2760 = vmatpush3.bf16.msra.mxu0 %v2818_v22  ;;  %v2870_v22 = vld [vmem:[%s3501_s10 + $0x80] sm:$0xff]  }
 0x81e   : > { %1948 = vmatprep.subr.bf16.mxu0 %v2824_v24  ;;  %v2884_v24 = vld [vmem:[%s3501_s10 + $0xe0] sm:$0xff]  }
 0x831   : > { %1525 = vrot.lane.b32.xlu0 %v3154_v43, %s2940_s25 }
 0x8a8   : > { %v1516_v9 = vpop.xlane.xlu0 %1515 }
 0x8a9   : > { %v1517_v10 = vsub.f32 %v1513_v7, %v1516_v9  ;;  %v2863_v7 = vld [vmem:[%s3499_s8 + $0xe4] ss:$16 sps:$4 sm:$0xff]   ;;  %v2861_v9 = vld [vmem:[%s3499_s8 + $0xe0] ss:$16 sps:$4 sm:$0xff]  }
 0x8ab   : > { %v1518_v11 = vmul.f32 1.442695, %v1517_v10  ;;  %v2864_v10 = vld [vmem:[%s3499_s8 + $0xe8] ss:$16 sps:$4 sm:$0xff]  }
 0x8ac   : > { %v1526_v12 = vpop.permute.xlu0 %1525 }
 0x8ad   : > { %2911 = vpow2.f32 %v1518_v11  ;;  %2753 = vmatpush3.msra.mxu1 %v1526_v12 }
 0x8ae   : > { %1907 = vmatprep.subr.bf16.mxu1 %v2821_v37  ;;  %v2882_v37 = vld [vmem:[%s3501_s10 + $0x98] sm:$0xff]  }
 0x8b7   : > { %v2912_v13 = vpop.eup %2911 }
 0x8b8   : > { %v1520_v14 = vsel %vm831_vm2, %v2912_v13, 0.0 }
 0x8b9   : > { %1521 = vadd.xlane.f32.xlu1 %v1520_v14 }
 0x8e7   : > { %v1427_v15 = vpop.f32.mrb[12].mxu0 }
 0x8e8   : > { %v1433_v16 = vadd.f32 %v1427_v15, %v1205_v54  ;;  %v2745_v43 = vpop.f32.mrb[13].mxu0  ;;  %v2839_v54 = vld [vmem:[%s3499_s8 + $0x64] ss:$16 sps:$4 sm:$0xff]  }
 0x8e9   : > { %v1430_v17 = vpop.f32.mrb[14].mxu0 }
 0x8ea   : > { %v2746_v18 = vpop.f32.mrb[15].mxu0 }
 0x946   : > { %v1522_v19 = vpop.xlane.xlu1 %1521 }
 0x947   : > { %2913 = vrcp.f32 %v1522_v19  ;;  %v2867_v19 = vld [vmem:[%s3501_s10 + $0x40] sm:$0xff]  }
 0x951   : > { %v2914_v20 = vpop.eup %2913 }
 0x952   : > { %v1524_v21 = vmul.f32 %v2914_v20, %v2912_v13  ;;  %v2868_v20 = vld [vmem:[%s3501_s10 + $0xc0] sm:$0xff]  }
 0x954   : > { %2755 = vmatmul.mubr.msk.f32.vlgmr.msra.gmra.mrb[18].mxu1 %vm831_vm2, %v1524_v21  ;;  %v2869_v21 = vld [vmem:[%s3501_s10] sm:$0xff]  }
 0x955   : > { %1939 = vmatprep.mubr.bf16.mxu1 %v2935_v2  ;;  %1908 = vmatpush1.bf16.msra.mxu1 %v2819_v36  ;;  %v2881_v36 = vld [vmem:[%s3501_s10 + $0x18] sm:$0xff]  }
 0x956   : > { %1909 = vmatprep.subr.bf16.mxu1 %v2827_v38  ;;  %v2885_v38 = vld [vmem:[%s3501_s10 + $0x20] sm:$0xff]  }
 0x959   : > { %1910 = vmatpush1.bf16.msra.mxu1 %v2825_v42  ;;  %v2887_v42 = vld [vmem:[%s3501_s10 + $0x68] sm:$0xff]  }
 0x95a   : > { %1911 = vmatprep.subr.bf16.mxu1 %v2833_v45  ;;  %v2889_v45 = vld [vmem:[%s3501_s10 + $0x28] sm:$0xff]  }
 0x95d   : > { %1912 = vmatpush1.bf16.msra.mxu1 %v2831_v47  ;;  %v2891_v47 = vld [vmem:[%s3501_s10 + $0x70] sm:$0xff]  }
 0x95e   : > { %1913 = vmatprep.subr.bf16.mxu1 %v2839_v54  ;;  %v2897_v54 = vld [vmem:[%s3501_s10 + $0x38] sm:$0xff]  }
 0x961   : > { %1914 = vmatpush1.bf16.msra.mxu1 %v2837_v56  ;;  %v1725_v56 = vld [vmem:[%s3500_s9] sm:$0xf] }
 0x962   : > { %1915 = vmatprep.subr.bf16.mxu1 %v2845_v58  ;;  %v1730_v58 = vrot.slane %v1725_v56, %v516_v31 }
 0x965   : > { %1916 = vmatpush1.bf16.msra.mxu1 %v2843_v40  ;;  %v1734_v40 = vrot.slane %v1725_v56, %v520_v29 }
 0x966   : > { %1917 = vmatprep.subr.bf16.mxu1 %v2851_v61 }
 0x969   : > { %1918 = vmatpush1.bf16.msra.mxu1 %v2849_v63 }
 0x96a   : > { %1919 = vmatprep.subr.bf16.mxu1 %v2857_v1 }
 0x96d   : > { %1920 = vmatpush1.bf16.msra.mxu1 %v2855_v5 }
 0x96e   : > { %1921 = vmatprep.subr.bf16.mxu1 %v2863_v7 }
 0x971   : > { %1922 = vmatpush1.bf16.msra.mxu1 %v2861_v9 }
 0x972   : > { %2629 = vmatprep.subr.bf16.mxu1 %v2867_v19 }
 0xa27   : > { %v1597_v23 = vpop.f32.mrb[18].mxu1 }
 0xa28   : > { %v1601_v4 = vpack.c.bf16 %v1597_v23, %v1597_v23  ;;  %v2756_v25 = vpop.f32.mrb[19].mxu1  ;;  %v2871_v23 = vld [vmem:[%s3501_s10 + $0x48] sm:$0xff]  }
 0xa29   : > { %v2873_v25 = vld [vmem:[%s3501_s10 + $0x8] sm:$0xff]  }
 0xa2a   : > { %2762 = vmatmul.mubr.msk.bf16.vlgmr.msra.gmra.mrb[16].mxu0 %vm746_vm1, %v1601_v4  ;;  %v2872_v4 = vld [vmem:[%s3501_s10 + $0xc8] sm:$0xff]  }
 0xa2b   : > { %1980 = vmatprep.mubr.bf16.mxu0 %v2935_v2  ;;  %v2822_v2 = vld [vmem:[%s3499_s8 + $0x8] ss:$16 sps:$4 sm:$0xff]  }
 0xa2c   : > { %1949 = vmatpush1.bf16.msra.mxu0 %v2822_v2  ;;  %v2883_v2 = vld [vmem:[%s3501_s10 + $0x60] sm:$0xff]  }
 0xa2d   : > { %1950 = vmatprep.subr.bf16.mxu0 %v2830_v41  ;;  %v2886_v41 = vld [vmem:[%s3501_s10 + $0xa0] sm:$0xff]  }
 0xa30   : > { %1951 = vmatpush1.bf16.msra.mxu0 %v2828_v44  ;;  %v2888_v44 = vld [vmem:[%s3501_s10 + $0xe8] sm:$0xff]  }
 0xa31   : > { %1952 = vmatprep.subr.bf16.mxu0 %v2836_v46  ;;  %v2890_v46 = vld [vmem:[%s3501_s10 + $0xa8] sm:$0xff]  }
 0xa34   : > { %1953 = vmatpush1.bf16.msra.mxu0 %v2834_v49  ;;  %v2892_v49 = vld [vmem:[%s3501_s10 + $0xf0] sm:$0xff]  }
 0xa35   : > { %1954 = vmatprep.subr.bf16.mxu0 %v2842_v55  ;;  %v2898_v55 = vld [vmem:[%s3501_s10 + $0xb8] sm:$0xff]  }
 0xa38   : > { %1955 = vmatpush1.bf16.msra.mxu0 %v2840_v57  ;;  %v1741_v57 = vsub.s32 3, %v3125_v28 }
 0xa39   : > { %1956 = vmatprep.subr.bf16.mxu0 %v2848_v59  ;;  %v1738_v59 = vrot.slane %v1725_v56, %v524_v39 }
 0xa3c   : > { %1957 = vmatpush1.bf16.msra.mxu0 %v2846_v60  ;;  %v1742_v60 = vrot.slane %v1725_v56, %v1741_v57 }
 0xa3d   : > { %1958 = vmatprep.subr.bf16.mxu0 %v2854_v62 }
 0xa40   : > { %1959 = vmatpush1.bf16.msra.mxu0 %v2852_v0 }
 0xa41   : > { %1960 = vmatprep.subr.bf16.mxu0 %v2860_v3 }
 0xa44   : > { %1961 = vmatpush1.bf16.msra.mxu0 %v2858_v6 }
 0xa45   : > { %1962 = vmatprep.subr.bf16.mxu0 %v2866_v8 }
 0xa48   : > { %1963 = vmatpush1.bf16.msra.mxu0 %v2864_v10 }
 0xa49   : > { %2651 = vmatprep.subr.bf16.mxu0 %v2868_v20 }
 0xafd   : > { %v1655_v27 = vpop.f32.mrb[16].mxu0 }
 0xafe   : > { %v1661_v30 = vadd.f32 %v1655_v27, %v1433_v16  ;;  %v2763_v32 = vpop.f32.mrb[17].mxu0  ;;  %v2522_v16 = vld [vmem:[%s3498_s7] ss:$0 sm:$0xff]  ;;  %v2875_v27 = vld [vmem:[%s3501_s10 + $0x50] sm:$0xff]  }
 0xaff   : > { %v1658_v33 = vpop.f32.mrb[18].mxu0  ;;  %v2877_v32 = vld [vmem:[%s3501_s10 + $0x10] sm:$0xff]  }
 0xb00   : > { %v2764_v34 = vpop.f32.mrb[19].mxu0  ;;  %v1663_v35 = vadd.f32 %v1662_v26, %v1661_v30  ;;  %v2874_v26 = vld [vmem:[%s3501_s10 + $0x88] sm:$0xff]   ;;  %v2876_v30 = vld [vmem:[%s3501_s10 + $0xd0] sm:$0xff]  }
 0xb01   : > { %v2878_v33 = vld [vmem:[%s3501_s10 + $0x90] sm:$0xff]   ;;  %v2879_v34 = vld [vmem:[%s3501_s10 + $0x58] sm:$0xff]  }
 0xb02   : > { %1666 = vadd.xlane.f32.xlu0 %v1663_v35 }
 0xb8f   : > { %v1667_v50 = vpop.xlane.xlu0 %1666 }
 0xb90   : > { %v1669_v51 = vmul.f32 0.0078125, %v1667_v50  ;;  %v2893_v50 = vld [vmem:[%s3501_s10 + $0x30] sm:$0xff]  }
 0xb92   : > { %v1670_v52 = vsub.f32 %v1663_v35, %v1669_v51  ;;  %v2880_v35 = vld [vmem:[%s3501_s10 + $0xd8] sm:$0xff]   ;;  %v2894_v51 = vld [vmem:[%s3501_s10 + $0xb0] sm:$0xff]  }
 0xb94   : > { %v1671_v53 = vmul.f32 %v1670_v52, %v1670_v52 }
 0xb96   : > { %1672 = vadd.xlane.f32.xlu1 %v1671_v53  ;;  %v2896_v53 = vld [vmem:[%s3501_s10 + $0xf8] sm:$0xff]  }
 0xc23   : > { %v1673_v11 = vpop.xlane.xlu1 %1672 }
 0xc24   : > { %v1674_v12 = vmul.f32 0.0078125, %v1673_v11 }
 0xc26   : > { %v1675_v13 = vadd.f32 1e-12, %v1674_v12 }
 0xc28   : > { %2915 = vrsqrt.f32 %v1675_v13 }
 0xc32   : > { %v2916_v14 = vpop.eup %2915 }
 0xc33   : > { %v1677_v15 = vmul.f32 %v2916_v14, %v1670_v52  ;;  %v2895_v52 = vld [vmem:[%s3501_s10 + $0x78] sm:$0xff]  }
 0xc35   : > { %v1684_v43 = vmul.f32 %v2521_v48, %v1677_v15 }
 0xc37   : > { %v3363_v17 = vadd.f32 %v2522_v16, %v1684_v43 }
 0xc39   : > { %v1692_v18 = vpack.c.bf16 %v3363_v17, %v3363_v17 }
 0xc3b   : > { %1940 = vmatmul.mubr.bf16.vlgmr.msra.gmra.mrb[20].mxu1 %v1692_v18  ;;  %1981 = vmatmul.mubr.bf16.vlgmr.msra.gmra.mrb[20].mxu0 %v1692_v18 }
 0xc3c   : > { %2630 = vmatpush3.bf16.msra.mxu1 %v2869_v21  ;;  %2652 = vmatpush3.bf16.msra.mxu0 %v2870_v22 }
 0xc3d   : > { %2631 = vmatprep.subr.bf16.mxu1 %v2871_v23  ;;  %2653 = vmatprep.subr.bf16.mxu0 %v2872_v4 }
 0xc40   : > { %2632 = vmatpush3.bf16.msra.mxu1 %v2873_v25  ;;  %2654 = vmatpush3.bf16.msra.mxu0 %v2874_v26 }
 0xc41   : > { %2633 = vmatprep.subr.bf16.mxu1 %v2875_v27  ;;  %2655 = vmatprep.subr.bf16.mxu0 %v2876_v30 }
 0xc44   : > { %2634 = vmatpush3.bf16.msra.mxu1 %v2877_v32  ;;  %2656 = vmatpush3.bf16.msra.mxu0 %v2878_v33 }
 0xc45   : > { %2635 = vmatprep.subr.bf16.mxu1 %v2879_v34  ;;  %2657 = vmatprep.subr.bf16.mxu0 %v2880_v35 }
 0xc48   : > { %2636 = vmatpush3.bf16.msra.mxu1 %v2881_v36  ;;  %2658 = vmatpush3.bf16.msra.mxu0 %v2882_v37 }
 0xc49   : > { %2637 = vmatprep.subr.bf16.mxu1 %v2883_v2  ;;  %2659 = vmatprep.subr.bf16.mxu0 %v2884_v24 }
 0xc4c   : > { %2638 = vmatpush3.bf16.msra.mxu1 %v2885_v38  ;;  %2660 = vmatpush3.bf16.msra.mxu0 %v2886_v41 }
 0xc4d   : > { %2639 = vmatprep.subr.bf16.mxu1 %v2887_v42  ;;  %2661 = vmatprep.subr.bf16.mxu0 %v2888_v44 }
 0xc50   : > { %2640 = vmatpush3.bf16.msra.mxu1 %v2889_v45  ;;  %2662 = vmatpush3.bf16.msra.mxu0 %v2890_v46 }
 0xc51   : > { %2641 = vmatprep.subr.bf16.mxu1 %v2891_v47  ;;  %2663 = vmatprep.subr.bf16.mxu0 %v2892_v49 }
 0xc54   : > { %2642 = vmatpush3.bf16.msra.mxu1 %v2893_v50  ;;  %2664 = vmatpush3.bf16.msra.mxu0 %v2894_v51 }
 0xc55   : > { %2643 = vmatprep.subr.bf16.mxu1 %v2895_v52  ;;  %2665 = vmatprep.subr.bf16.mxu0 %v2896_v53  ;;  %v2555_v53 = vld [vmem:[%s3502_s11] ss:$0 sm:$0xff] }
 0xc58   : > { %2644 = vmatpush3.bf16.msra.mxu1 %v2897_v54  ;;  %2666 = vmatpush3.bf16.msra.mxu0 %v2898_v55 }
 0xd0e   : > { %v1941_v61 = vpop.f32.mrb[20].mxu1  ;;  %v1982_v62 = vpop.f32.mrb[20].mxu0 }
 0xd0f   : > { %v1942_v63 = vadd.f32 %v1941_v61, %v1730_v58  ;;  %v1983_v0 = vadd.f32 %v1982_v62, %v1738_v59  ;;  %v1943_v1 = vpop.f32.mrb[21].mxu1  ;;  %v1984_v3 = vpop.f32.mrb[21].mxu0 }
 0xd10   : > { %v1944_v5 = vadd.f32 %v1943_v1, %v1734_v40  ;;  %v1985_v6 = vadd.f32 %v1984_v3, %v1742_v60  ;;  %v1945_v7 = vpop.f32.mrb[22].mxu1  ;;  %v1986_v8 = vpop.f32.mrb[22].mxu0 }
 0xd11   : > { %v1993_v9 = vmul.f32 0.044715, %v1942_v63  ;;  %v1995_v10 = vmul.f32 0.044715, %v1983_v0  ;;  %v1946_v31 = vpop.f32.mrb[23].mxu1  ;;  %v1987_v11 = vpop.f32.mrb[23].mxu0 }
 0xd12   : > { %v1994_v12 = vmul.f32 0.044715, %v1944_v5  ;;  %v1996_v39 = vmul.f32 0.044715, %v1985_v6  ;;  %v1989_v30 = vmul.f32 0.5, %v1942_v63  ;;  %v1990_v34 = vmul.f32 0.5, %v1944_v5 }
 0xd13   : > { %v1997_v13 = vmul.f32 %v1993_v9, %v1942_v63  ;;  %v1999_v28 = vmul.f32 %v1995_v10, %v1983_v0  ;;  %v1992_v37 = vmul.f32 0.5, %v1985_v6  ;;  %v1991_v41 = vmul.f32 0.5, %v1983_v0  ;;  %v2588_v10 = vld [vmem:[%s3503_s12] ss:$0 sm:$0xff] }
 0xd14   : > { %v1998_v29 = vmul.f32 %v1994_v12, %v1944_v5  ;;  %v2000_v14 = vmul.f32 %v1996_v39, %v1985_v6 }
 0xd15   : > { %v2001_v48 = vmul.f32 %v1997_v13, %v1942_v63  ;;  %v2003_v15 = vmul.f32 %v1999_v28, %v1983_v0 }
 0xd16   : > { %v2002_v16 = vmul.f32 %v1998_v29, %v1944_v5  ;;  %v2004_v43 = vmul.f32 %v2000_v14, %v1985_v6 }
 0xd17   : > { %v2005_v18 = vadd.f32 %v2001_v48, %v1942_v63  ;;  %v2007_v19 = vadd.f32 %v2003_v15, %v1983_v0 }
 0xd18   : > { %v2006_v20 = vadd.f32 %v2002_v16, %v1944_v5  ;;  %v2008_v21 = vadd.f32 %v2004_v43, %v1985_v6 }
 0xd19   : > { %v2009_v22 = vmul.f32 0.7978846, %v2005_v18  ;;  %v2011_v25 = vmul.f32 0.7978846, %v2007_v19 }
 0xd1a   : > { %v2010_v23 = vmul.f32 0.7978846, %v2006_v20  ;;  %v2012_v4 = vmul.f32 0.7978846, %v2008_v21 }
 0xd1b   : > { %2917 = vtanh.f32 %v2009_v22 }
 0xd1c   : > { %2919 = vtanh.f32 %v2010_v23 }
 0xd1d   : > { %2921 = vtanh.f32 %v2012_v4 }
 0xd1e   : > { %2923 = vtanh.f32 %v2011_v25 }
 0xd25   : > { %v2918_v26 = vpop.eup %2917 }
 0xd26   : > { %v2920_v27 = vpop.eup %2919  ;;  %v2017_v32 = vadd.f32 1.0, %v2918_v26 }
 0xd27   : > { %v2922_v33 = vpop.eup %2921  ;;  %v2018_v35 = vadd.f32 1.0, %v2920_v27 }
 0xd28   : > { %v2924_v36 = vpop.eup %2923  ;;  %v2020_v2 = vadd.f32 1.0, %v2922_v33  ;;  %v2021_v24 = vmul.f32 %v2017_v32, %v1989_v30 }
 0xd29   : > { %v2022_v38 = vmul.f32 %v2018_v35, %v1990_v34  ;;  %v2019_v42 = vadd.f32 1.0, %v2924_v36 }
 0xd2a   : > { %v2024_v44 = vmul.f32 %v2020_v2, %v1992_v37  ;;  %v2025_v49 = vpack.c.bf16 %v2021_v24, %v2021_v24 }
 0xd2b   : > { %v2026_v45 = vpack.c.bf16 %v2022_v38, %v2022_v38  ;;  %v2023_v46 = vmul.f32 %v2019_v42, %v1991_v41 }
 0xd2c   : > { %v2028_v47 = vpack.c.bf16 %v2024_v44, %v2024_v44 }
 0xd2d   : > { %2324 = vmatprep.mubr.bf16.mxu1 %v2026_v45  ;;  %v2027_v50 = vpack.c.bf16 %v2023_v46, %v2023_v46 }
 0xd2e   : > { %2364 = vmatprep.mubr.bf16.mxu0 %v2028_v47  ;;  %2325 = vmatmul.mubr.bf16.vlgmr.msra.gmra.mrb[24].mxu1 %v2025_v49 }
 0xd2f   : > { %2365 = vmatmul.mubr.bf16.vlgmr.msra.gmra.mrb[24].mxu0 %v2027_v50 }
 0xe01   : > { %v2645_v51 = vpop.f32.mrb[24].mxu1 }
 0xe02   : > { %v2667_v52 = vpop.f32.mrb[24].mxu0  ;;  %v2646_v54 = vpop.f32.mrb[25].mxu1 }
 0xe03   : > { %v2647_v55 = vadd.f32 %v2646_v54, %v2645_v51  ;;  %v2668_v56 = vpop.f32.mrb[25].mxu0  ;;  %v2648_v57 = vpop.f32.mrb[26].mxu1 }
 0xe04   : > { %v2669_v58 = vadd.f32 %v2668_v56, %v2667_v52  ;;  %v2670_v59 = vpop.f32.mrb[26].mxu0  ;;  %v2649_v40 = vpop.f32.mrb[27].mxu1 }
 0xe05   : > { %v2327_v60 = vadd.f32 %v2647_v55, %v2555_v53  ;;  %v2671_v61 = vpop.f32.mrb[27].mxu0 }
 0xe07   : > { %v2367_v62 = vadd.f32 %v2669_v58, %v2327_v60 }
 0xe09   : > { %v2372_v63 = vadd.f32 %v2367_v62, %v3363_v17  ;;  %v2589_v17 = vld [vmem:[%s3504_s13] ss:$0 sm:$0xff] }
 0xe0b   : > { %2375 = vadd.xlane.f32.xlu1 %v2372_v63 }
 0xe98   : > { %v2376_v0 = vpop.xlane.xlu1 %2375 }
 0xe99   : > { %v2377_v1 = vmul.f32 0.0078125, %v2376_v0 }
 0xe9b   : > { %v2378_v3 = vsub.f32 %v2372_v63, %v2377_v1 }
 0xe9d   : > { %v2379_v5 = vmul.f32 %v2378_v3, %v2378_v3 }
 0xe9f   : > { %2380 = vadd.xlane.f32.xlu1 %v2379_v5 }
 0xf2c   : > { %v2381_v6 = vpop.xlane.xlu1 %2380 }
 0xf2d   : > { %v2382_v7 = vmul.f32 0.0078125, %v2381_v6 }
 0xf2f   : > { %v2383_v8 = vadd.f32 1e-12, %v2382_v7 }
 0xf31   : > { %2925 = vrsqrt.f32 %v2383_v8 }
 0xf3b   : > { %v2926_v9 = vpop.eup %2925 }
 0xf3c   : > { %v2385_v31 = vmul.f32 %v2926_v9, %v2378_v3 }
 0xf3e   : > { %v2392_v11 = vmul.f32 %v2588_v10, %v2385_v31 }
 0xf40   : > { %v2399_v12 = vadd.f32 %v2589_v17, %v2392_v11 }
 0xf42   : > { %v2400_v39 = vpack.c.bf16 %v2399_v12, %v2399_v12 }
 0xf44   : > { %2401 = vst [vmem:[%s476_s26] sm:$0xf] %v2400_v39 }
 0xf45 PF: > { %s24_s29 = sadd.s32 1, %s2933_s29  }
 0xf46   : > { %p21_p4 = scmp.ge.s32.totalorder %s24_s29, 4  }
 0xf48   :  { %23 = sbr.rel (!%p21_p4) target bundleno = 1 (0x1), region = 109 }

</bundles_post_ra>
